<compile_context>
chip_gen: v6e
topology: v6e:2x2x1
jax: 0.10.0
libtpu: 0.0.40
codegen_flags: <defaults>
</compile_context>

<pallas_src>
import jax
import jax.numpy as jnp
from jax.experimental import pallas as pl
from jax.experimental.pallas import tpu as pltpu

GRID_H = 30
GRID_W = 30
NUM_PIX = GRID_H * GRID_W          # 900
NUM_CLASS = 11
EMB_SIZE = 3
FIRST_SIZE = 2
LATENT_SIZE = 1


# ----------------------------------------------------------------------------
# In-kernel helpers
# ----------------------------------------------------------------------------
def _affine_t(w, b, x, relu):
    """y = W @ x + b in transposed layout.

    w: (Co, Ci) (PyTorch Linear weight layout), b: (Co, 1), x: (Ci, P)
    -> (Co, P).  Unrolled over the tiny contraction dim Ci -> pure VPU FMAs.
    """
    co, ci = w.shape
    p = x.shape[-1]
    acc = jnp.zeros((co, p), dtype=jnp.float32)
    for j in range(ci):
        acc = acc + w[:, j:j + 1] * x[j:j + 1, :]
    acc = acc + b
    if relu:
        acc = jnp.maximum(acc, 0.0)
    return acc


def _vae_kernel(idx_ref, eps_ref, emb_t_ref,
                e1w_ref, e1b_ref, e2w_ref, e2b_ref,
                mw_ref, mb_ref,
                d1w_ref, d1b_ref, d2w_ref, d2b_ref,
                pw_ref, pb_ref,
                out_ref):
    """One grid step = one image (900 pixels on the lane axis)."""
    idx = idx_ref[0]                       # (1, P) int32
    eps = eps_ref[0]                       # (1, P) f32
    p = idx.shape[-1]

    # Embedding lookup: select-accumulate over the 11 classes (VPU only).
    emb_t = emb_t_ref[...]                 # (3, 11)
    e = jnp.zeros((emb_t.shape[0], p), dtype=jnp.float32)
    for k in range(emb_t.shape[1]):
        e = e + emb_t[:, k:k + 1] * (idx == k).astype(jnp.float32)   # (3, P)

    # Encoder.
    h = _affine_t(e1w_ref[...], e1b_ref[...], e, relu=True)          # (2, P)
    h = _affine_t(e2w_ref[...], e2b_ref[...], h, relu=True)          # (1, P)

    # mu == sigma: the original module calls mu_layer for BOTH.
    mu = _affine_t(mw_ref[...], mb_ref[...], h, relu=False)          # (1, P)
    std = jnp.exp(0.5 * mu)
    z = mu + std * eps                                               # (1, P)

    # Decoder + projection (fused, no HBM intermediates).
    d = _affine_t(d1w_ref[...], d1b_ref[...], z, relu=True)          # (2, P)
    d = _affine_t(d2w_ref[...], d2b_ref[...], d, relu=True)          # (3, P)
    out_ref[0] = _affine_t(pw_ref[...], pb_ref[...], d, relu=False)  # (11, P)


# ----------------------------------------------------------------------------
# pallas_call wrapper
# ----------------------------------------------------------------------------
def vae_forward_pallas(params, idx, eps):
    """idx: (B, 1, 900) int32, eps: (B, 1, 900) f32 -> (B, 11, 900) f32."""
    B, _, P = idx.shape
    weights = (params["emb_t"],
               params["enc1_w"], params["enc1_b"],
               params["enc2_w"], params["enc2_b"],
               params["mu_w"], params["mu_b"],
               params["dec1_w"], params["dec1_b"],
               params["dec2_w"], params["dec2_b"],
               params["proj_w"], params["proj_b"])

    in_specs = (
        [pl.BlockSpec((1, 1, P), lambda b: (b, 0, 0)),    # class indices
         pl.BlockSpec((1, 1, P), lambda b: (b, 0, 0))]    # eps
        # Small weights: full-array blocks, constant index map (stay VMEM-resident).
        + [pl.BlockSpec(w.shape, lambda b: (0, 0)) for w in weights]
    )

    return pl.pallas_call(
        _vae_kernel,
        grid=(B,),
        in_specs=in_specs,
        out_specs=pl.BlockSpec((1, NUM_CLASS, P), lambda b: (b, 0, 0)),
        out_shape=jax.ShapeDtypeStruct((B, NUM_CLASS, P), jnp.float32),
        compiler_params=pltpu.CompilerParams(
            dimension_semantics=("parallel",)),
    )(idx, eps, *weights)


# ----------------------------------------------------------------------------
# Forward pass (mirrors vae_v1_1.forward)
# ----------------------------------------------------------------------------
def forward(params, x, eps_key):
    """x: (B, 30, 30) integer grid (or (30, 30)); returns (B, 11, 30, 30) f32."""
    B = x.shape[0] if x.ndim >= 3 else 1
    idx = x.reshape(B, 1, NUM_PIX).astype(jnp.int32)
    # eps = randn_like(std): one standard normal per pixel.
    eps = jax.random.normal(eps_key, (B, 1, NUM_PIX), dtype=jnp.float32)
    out_t = vae_forward_pallas(params, idx, eps)          # (B, 11, 900)
    # Kernel output is already channel-major -> equals torch's
    # reshape(-1, 30, 30, 11).permute(0, 3, 1, 2) without any transpose.
    return out_t.reshape(B, NUM_CLASS, GRID_H, GRID_W)


# ----------------------------------------------------------------------------
# Deterministic synthetic parameters (shapes from vae_v1_1.__init__).
# Layout transposes / bias reshapes are done ONCE here, not per forward call.
# ----------------------------------------------------------------------------
def init_params(key):
    ks = jax.random.split(key, 16)

    def nrm(k, shape, scale=0.1):
        return scale * jax.random.normal(k, shape, dtype=jnp.float32)

    emb = nrm(ks[0], (NUM_CLASS, EMB_SIZE)).at[0].set(0.0)   # padding_idx=0 row
    p = {
        "emb_t":  emb.T,                                     # (3, 11), pre-transposed
        # encoder: Linear(3,2), Linear(2,1)  (PyTorch (out,in) weights)
        "enc1_w": nrm(ks[1], (FIRST_SIZE, EMB_SIZE)),
        "enc1_b": nrm(ks[2], (FIRST_SIZE,)).reshape(FIRST_SIZE, 1),
        "enc2_w": nrm(ks[3], (LATENT_SIZE, FIRST_SIZE)),
        "enc2_b": nrm(ks[4], (LATENT_SIZE,)).reshape(LATENT_SIZE, 1),
        # mu layer (used twice in forward)
        "mu_w":   nrm(ks[5], (LATENT_SIZE, LATENT_SIZE)),
        "mu_b":   nrm(ks[6], (LATENT_SIZE,)).reshape(LATENT_SIZE, 1),
        # sigma layer exists in the module but forward never uses it (kept for parity)
        "sigma_w": nrm(ks[7], (LATENT_SIZE, LATENT_SIZE)),
        "sigma_b": nrm(ks[8], (LATENT_SIZE,)).reshape(LATENT_SIZE, 1),
        # decoder: Linear(1,2), Linear(2,3)
        "dec1_w": nrm(ks[9], (FIRST_SIZE, LATENT_SIZE)),
        "dec1_b": nrm(ks[10], (FIRST_SIZE,)).reshape(FIRST_SIZE, 1),
        "dec2_w": nrm(ks[11], (EMB_SIZE, FIRST_SIZE)),
        "dec2_b": nrm(ks[12], (EMB_SIZE,)).reshape(EMB_SIZE, 1),
        # proj: Linear(3, 11)
        "proj_w": nrm(ks[13], (NUM_CLASS, EMB_SIZE)),
        "proj_b": nrm(ks[14], (NUM_CLASS,)).reshape(NUM_CLASS, 1),
    }
    return p


if __name__ == "__main__":
    key = jax.random.PRNGKey(0)
    pkey, xkey, ekey = jax.random.split(key, 3)
    params = init_params(pkey)
    # input: integer class grid, values in [0, 11), shape (B, 30, 30)
    x = jax.random.randint(xkey, (2, GRID_H, GRID_W), 0, NUM_CLASS, dtype=jnp.int32)
    out = jax.jit(forward)(params, x, ekey)
    jax.block_until_ready(out)
    assert out.shape == (2, NUM_CLASS, GRID_H, GRID_W) and out.dtype == jnp.float32
    print("KERNEL_OK")
</pallas_src>

<mosaic_0001>
module attributes {stable_mosaic.version = 11 : i64} {
  func.func @_vae_kernel(%arg0: i32, %arg1: memref<1x1x900xi32, #tpu.memory_space<vmem>>, %arg2: memref<1x1x900xf32, #tpu.memory_space<vmem>>, %arg3: memref<3x11xf32, #tpu.memory_space<vmem>>, %arg4: memref<2x3xf32, #tpu.memory_space<vmem>>, %arg5: memref<2x1xf32, #tpu.memory_space<vmem>>, %arg6: memref<1x2xf32, #tpu.memory_space<vmem>>, %arg7: memref<1x1xf32, #tpu.memory_space<vmem>>, %arg8: memref<1x1xf32, #tpu.memory_space<vmem>>, %arg9: memref<1x1xf32, #tpu.memory_space<vmem>>, %arg10: memref<2x1xf32, #tpu.memory_space<vmem>>, %arg11: memref<2x1xf32, #tpu.memory_space<vmem>>, %arg12: memref<3x2xf32, #tpu.memory_space<vmem>>, %arg13: memref<3x1xf32, #tpu.memory_space<vmem>>, %arg14: memref<11x3xf32, #tpu.memory_space<vmem>>, %arg15: memref<11x1xf32, #tpu.memory_space<vmem>>, %arg16: memref<1x11x900xf32, #tpu.memory_space<vmem>>) attributes {dimension_semantics = [#tpu.dimension_semantics<parallel>], iteration_bounds = array<i64: 2>, scalar_prefetch = 0 : i64, scratch_operands = 0 : i64, tpu.core_type = #tpu.core_type<tc>, window_params = [{transform_indices = @transform_0, window_bounds = array<i64: 1, 1, 900>}, {transform_indices = @transform_1, window_bounds = array<i64: 1, 1, 900>}, {pipeline_mode = #tpu.pipeline_mode<synchronous>, transform_indices = @transform_2, window_bounds = array<i64: 3, 11>}, {pipeline_mode = #tpu.pipeline_mode<synchronous>, transform_indices = @transform_3, window_bounds = array<i64: 2, 3>}, {pipeline_mode = #tpu.pipeline_mode<synchronous>, transform_indices = @transform_4, window_bounds = array<i64: 2, 1>}, {pipeline_mode = #tpu.pipeline_mode<synchronous>, transform_indices = @transform_5, window_bounds = array<i64: 1, 2>}, {pipeline_mode = #tpu.pipeline_mode<synchronous>, transform_indices = @transform_6, window_bounds = array<i64: 1, 1>}, {pipeline_mode = #tpu.pipeline_mode<synchronous>, transform_indices = @transform_7, window_bounds = array<i64: 1, 1>}, {pipeline_mode = #tpu.pipeline_mode<synchronous>, transform_indices = @transform_8, window_bounds = array<i64: 1, 1>}, {pipeline_mode = #tpu.pipeline_mode<synchronous>, transform_indices = @transform_9, window_bounds = array<i64: 2, 1>}, {pipeline_mode = #tpu.pipeline_mode<synchronous>, transform_indices = @transform_10, window_bounds = array<i64: 2, 1>}, {pipeline_mode = #tpu.pipeline_mode<synchronous>, transform_indices = @transform_11, window_bounds = array<i64: 3, 2>}, {pipeline_mode = #tpu.pipeline_mode<synchronous>, transform_indices = @transform_12, window_bounds = array<i64: 3, 1>}, {pipeline_mode = #tpu.pipeline_mode<synchronous>, transform_indices = @transform_13, window_bounds = array<i64: 11, 3>}, {pipeline_mode = #tpu.pipeline_mode<synchronous>, transform_indices = @transform_14, window_bounds = array<i64: 11, 1>}, {transform_indices = @transform_15, window_bounds = array<i64: 1, 11, 900>}]} {
    %c0 = arith.constant 0 : index
    %c0_0 = arith.constant 0 : index
    %c0_1 = arith.constant 0 : index
    %0 = vector.load %arg1[%c0, %c0_0, %c0_1] : memref<1x1x900xi32, #tpu.memory_space<vmem>>, vector<1x1x900xi32>
    %1 = vector.shape_cast %0 : vector<1x1x900xi32> to vector<1x900xi32>
    %c0_2 = arith.constant 0 : index
    %c0_3 = arith.constant 0 : index
    %c0_4 = arith.constant 0 : index
    %2 = vector.load %arg2[%c0_2, %c0_3, %c0_4] : memref<1x1x900xf32, #tpu.memory_space<vmem>>, vector<1x1x900xf32>
    %3 = vector.shape_cast %2 : vector<1x1x900xf32> to vector<1x900xf32>
    %c0_5 = arith.constant 0 : index
    %c0_6 = arith.constant 0 : index
    %4 = vector.load %arg3[%c0_5, %c0_6] : memref<3x11xf32, #tpu.memory_space<vmem>>, vector<3x11xf32>
    %cst = arith.constant 0.000000e+00 : f32
    %5 = vector.broadcast %cst : f32 to vector<3x900xf32>
    %6 = vector.extract_strided_slice %4 {offsets = [0, 0], sizes = [3, 1], strides = [1, 1]} : vector<3x11xf32> to vector<3x1xf32>
    %c0_i32 = arith.constant 0 : i32
    %7 = vector.broadcast %c0_i32 : i32 to vector<1x900xi32>
    %8 = arith.cmpi eq, %1, %7 : vector<1x900xi32>
    %9 = arith.extui %8 : vector<1x900xi1> to vector<1x900xi32>
    %10 = arith.sitofp %9 : vector<1x900xi32> to vector<1x900xf32>
    %11 = vector.broadcast %6 : vector<3x1xf32> to vector<3x900xf32>
    %12 = vector.broadcast %10 : vector<1x900xf32> to vector<3x900xf32>
    %13 = arith.mulf %11, %12 : vector<3x900xf32>
    %14 = arith.addf %5, %13 : vector<3x900xf32>
    %15 = vector.extract_strided_slice %4 {offsets = [0, 1], sizes = [3, 1], strides = [1, 1]} : vector<3x11xf32> to vector<3x1xf32>
    %c1_i32 = arith.constant 1 : i32
    %16 = vector.broadcast %c1_i32 : i32 to vector<1x900xi32>
    %17 = arith.cmpi eq, %1, %16 : vector<1x900xi32>
    %18 = arith.extui %17 : vector<1x900xi1> to vector<1x900xi32>
    %19 = arith.sitofp %18 : vector<1x900xi32> to vector<1x900xf32>
    %20 = vector.broadcast %15 : vector<3x1xf32> to vector<3x900xf32>
    %21 = vector.broadcast %19 : vector<1x900xf32> to vector<3x900xf32>
    %22 = arith.mulf %20, %21 : vector<3x900xf32>
    %23 = arith.addf %14, %22 : vector<3x900xf32>
    %24 = vector.extract_strided_slice %4 {offsets = [0, 2], sizes = [3, 1], strides = [1, 1]} : vector<3x11xf32> to vector<3x1xf32>
    %c2_i32 = arith.constant 2 : i32
    %25 = vector.broadcast %c2_i32 : i32 to vector<1x900xi32>
    %26 = arith.cmpi eq, %1, %25 : vector<1x900xi32>
    %27 = arith.extui %26 : vector<1x900xi1> to vector<1x900xi32>
    %28 = arith.sitofp %27 : vector<1x900xi32> to vector<1x900xf32>
    %29 = vector.broadcast %24 : vector<3x1xf32> to vector<3x900xf32>
    %30 = vector.broadcast %28 : vector<1x900xf32> to vector<3x900xf32>
    %31 = arith.mulf %29, %30 : vector<3x900xf32>
    %32 = arith.addf %23, %31 : vector<3x900xf32>
    %33 = vector.extract_strided_slice %4 {offsets = [0, 3], sizes = [3, 1], strides = [1, 1]} : vector<3x11xf32> to vector<3x1xf32>
    %c3_i32 = arith.constant 3 : i32
    %34 = vector.broadcast %c3_i32 : i32 to vector<1x900xi32>
    %35 = arith.cmpi eq, %1, %34 : vector<1x900xi32>
    %36 = arith.extui %35 : vector<1x900xi1> to vector<1x900xi32>
    %37 = arith.sitofp %36 : vector<1x900xi32> to vector<1x900xf32>
    %38 = vector.broadcast %33 : vector<3x1xf32> to vector<3x900xf32>
    %39 = vector.broadcast %37 : vector<1x900xf32> to vector<3x900xf32>
    %40 = arith.mulf %38, %39 : vector<3x900xf32>
    %41 = arith.addf %32, %40 : vector<3x900xf32>
    %42 = vector.extract_strided_slice %4 {offsets = [0, 4], sizes = [3, 1], strides = [1, 1]} : vector<3x11xf32> to vector<3x1xf32>
    %c4_i32 = arith.constant 4 : i32
    %43 = vector.broadcast %c4_i32 : i32 to vector<1x900xi32>
    %44 = arith.cmpi eq, %1, %43 : vector<1x900xi32>
    %45 = arith.extui %44 : vector<1x900xi1> to vector<1x900xi32>
    %46 = arith.sitofp %45 : vector<1x900xi32> to vector<1x900xf32>
    %47 = vector.broadcast %42 : vector<3x1xf32> to vector<3x900xf32>
    %48 = vector.broadcast %46 : vector<1x900xf32> to vector<3x900xf32>
    %49 = arith.mulf %47, %48 : vector<3x900xf32>
    %50 = arith.addf %41, %49 : vector<3x900xf32>
    %51 = vector.extract_strided_slice %4 {offsets = [0, 5], sizes = [3, 1], strides = [1, 1]} : vector<3x11xf32> to vector<3x1xf32>
    %c5_i32 = arith.constant 5 : i32
    %52 = vector.broadcast %c5_i32 : i32 to vector<1x900xi32>
    %53 = arith.cmpi eq, %1, %52 : vector<1x900xi32>
    %54 = arith.extui %53 : vector<1x900xi1> to vector<1x900xi32>
    %55 = arith.sitofp %54 : vector<1x900xi32> to vector<1x900xf32>
    %56 = vector.broadcast %51 : vector<3x1xf32> to vector<3x900xf32>
    %57 = vector.broadcast %55 : vector<1x900xf32> to vector<3x900xf32>
    %58 = arith.mulf %56, %57 : vector<3x900xf32>
    %59 = arith.addf %50, %58 : vector<3x900xf32>
    %60 = vector.extract_strided_slice %4 {offsets = [0, 6], sizes = [3, 1], strides = [1, 1]} : vector<3x11xf32> to vector<3x1xf32>
    %c6_i32 = arith.constant 6 : i32
    %61 = vector.broadcast %c6_i32 : i32 to vector<1x900xi32>
    %62 = arith.cmpi eq, %1, %61 : vector<1x900xi32>
    %63 = arith.extui %62 : vector<1x900xi1> to vector<1x900xi32>
    %64 = arith.sitofp %63 : vector<1x900xi32> to vector<1x900xf32>
    %65 = vector.broadcast %60 : vector<3x1xf32> to vector<3x900xf32>
    %66 = vector.broadcast %64 : vector<1x900xf32> to vector<3x900xf32>
    %67 = arith.mulf %65, %66 : vector<3x900xf32>
    %68 = arith.addf %59, %67 : vector<3x900xf32>
    %69 = vector.extract_strided_slice %4 {offsets = [0, 7], sizes = [3, 1], strides = [1, 1]} : vector<3x11xf32> to vector<3x1xf32>
    %c7_i32 = arith.constant 7 : i32
    %70 = vector.broadcast %c7_i32 : i32 to vector<1x900xi32>
    %71 = arith.cmpi eq, %1, %70 : vector<1x900xi32>
    %72 = arith.extui %71 : vector<1x900xi1> to vector<1x900xi32>
    %73 = arith.sitofp %72 : vector<1x900xi32> to vector<1x900xf32>
    %74 = vector.broadcast %69 : vector<3x1xf32> to vector<3x900xf32>
    %75 = vector.broadcast %73 : vector<1x900xf32> to vector<3x900xf32>
    %76 = arith.mulf %74, %75 : vector<3x900xf32>
    %77 = arith.addf %68, %76 : vector<3x900xf32>
    %78 = vector.extract_strided_slice %4 {offsets = [0, 8], sizes = [3, 1], strides = [1, 1]} : vector<3x11xf32> to vector<3x1xf32>
    %c8_i32 = arith.constant 8 : i32
    %79 = vector.broadcast %c8_i32 : i32 to vector<1x900xi32>
    %80 = arith.cmpi eq, %1, %79 : vector<1x900xi32>
    %81 = arith.extui %80 : vector<1x900xi1> to vector<1x900xi32>
    %82 = arith.sitofp %81 : vector<1x900xi32> to vector<1x900xf32>
    %83 = vector.broadcast %78 : vector<3x1xf32> to vector<3x900xf32>
    %84 = vector.broadcast %82 : vector<1x900xf32> to vector<3x900xf32>
    %85 = arith.mulf %83, %84 : vector<3x900xf32>
    %86 = arith.addf %77, %85 : vector<3x900xf32>
    %87 = vector.extract_strided_slice %4 {offsets = [0, 9], sizes = [3, 1], strides = [1, 1]} : vector<3x11xf32> to vector<3x1xf32>
    %c9_i32 = arith.constant 9 : i32
    %88 = vector.broadcast %c9_i32 : i32 to vector<1x900xi32>
    %89 = arith.cmpi eq, %1, %88 : vector<1x900xi32>
    %90 = arith.extui %89 : vector<1x900xi1> to vector<1x900xi32>
    %91 = arith.sitofp %90 : vector<1x900xi32> to vector<1x900xf32>
    %92 = vector.broadcast %87 : vector<3x1xf32> to vector<3x900xf32>
    %93 = vector.broadcast %91 : vector<1x900xf32> to vector<3x900xf32>
    %94 = arith.mulf %92, %93 : vector<3x900xf32>
    %95 = arith.addf %86, %94 : vector<3x900xf32>
    %96 = vector.extract_strided_slice %4 {offsets = [0, 10], sizes = [3, 1], strides = [1, 1]} : vector<3x11xf32> to vector<3x1xf32>
    %c10_i32 = arith.constant 10 : i32
    %97 = vector.broadcast %c10_i32 : i32 to vector<1x900xi32>
    %98 = arith.cmpi eq, %1, %97 : vector<1x900xi32>
    %99 = arith.extui %98 : vector<1x900xi1> to vector<1x900xi32>
    %100 = arith.sitofp %99 : vector<1x900xi32> to vector<1x900xf32>
    %101 = vector.broadcast %96 : vector<3x1xf32> to vector<3x900xf32>
    %102 = vector.broadcast %100 : vector<1x900xf32> to vector<3x900xf32>
    %103 = arith.mulf %101, %102 : vector<3x900xf32>
    %104 = arith.addf %95, %103 : vector<3x900xf32>
    %c0_7 = arith.constant 0 : index
    %c0_8 = arith.constant 0 : index
    %105 = vector.load %arg4[%c0_7, %c0_8] : memref<2x3xf32, #tpu.memory_space<vmem>>, vector<2x3xf32>
    %c0_9 = arith.constant 0 : index
    %c0_10 = arith.constant 0 : index
    %106 = vector.load %arg5[%c0_9, %c0_10] : memref<2x1xf32, #tpu.memory_space<vmem>>, vector<2x1xf32>
    %cst_11 = arith.constant 0.000000e+00 : f32
    %107 = vector.broadcast %cst_11 : f32 to vector<2x900xf32>
    %108 = vector.extract_strided_slice %105 {offsets = [0, 0], sizes = [2, 1], strides = [1, 1]} : vector<2x3xf32> to vector<2x1xf32>
    %109 = vector.extract_strided_slice %104 {offsets = [0, 0], sizes = [1, 900], strides = [1, 1]} : vector<3x900xf32> to vector<1x900xf32>
    %110 = vector.broadcast %108 : vector<2x1xf32> to vector<2x900xf32>
    %111 = vector.broadcast %109 : vector<1x900xf32> to vector<2x900xf32>
    %112 = arith.mulf %110, %111 : vector<2x900xf32>
    %113 = arith.addf %107, %112 : vector<2x900xf32>
    %114 = vector.extract_strided_slice %105 {offsets = [0, 1], sizes = [2, 1], strides = [1, 1]} : vector<2x3xf32> to vector<2x1xf32>
    %115 = vector.extract_strided_slice %104 {offsets = [1, 0], sizes = [1, 900], strides = [1, 1]} : vector<3x900xf32> to vector<1x900xf32>
    %116 = vector.broadcast %114 : vector<2x1xf32> to vector<2x900xf32>
    %117 = vector.broadcast %115 : vector<1x900xf32> to vector<2x900xf32>
    %118 = arith.mulf %116, %117 : vector<2x900xf32>
    %119 = arith.addf %113, %118 : vector<2x900xf32>
    %120 = vector.extract_strided_slice %105 {offsets = [0, 2], sizes = [2, 1], strides = [1, 1]} : vector<2x3xf32> to vector<2x1xf32>
    %121 = vector.extract_strided_slice %104 {offsets = [2, 0], sizes = [1, 900], strides = [1, 1]} : vector<3x900xf32> to vector<1x900xf32>
    %122 = vector.broadcast %120 : vector<2x1xf32> to vector<2x900xf32>
    %123 = vector.broadcast %121 : vector<1x900xf32> to vector<2x900xf32>
    %124 = arith.mulf %122, %123 : vector<2x900xf32>
    %125 = arith.addf %119, %124 : vector<2x900xf32>
    %126 = vector.broadcast %106 : vector<2x1xf32> to vector<2x900xf32>
    %127 = arith.addf %125, %126 : vector<2x900xf32>
    %cst_12 = arith.constant 0.000000e+00 : f32
    %128 = vector.broadcast %cst_12 : f32 to vector<2x900xf32>
    %129 = arith.maximumf %127, %128 : vector<2x900xf32>
    %c0_13 = arith.constant 0 : index
    %c0_14 = arith.constant 0 : index
    %130 = vector.load %arg6[%c0_13, %c0_14] : memref<1x2xf32, #tpu.memory_space<vmem>>, vector<1x2xf32>
    %c0_15 = arith.constant 0 : index
    %c0_16 = arith.constant 0 : index
    %131 = vector.load %arg7[%c0_15, %c0_16] : memref<1x1xf32, #tpu.memory_space<vmem>>, vector<1x1xf32>
    %cst_17 = arith.constant 0.000000e+00 : f32
    %132 = vector.broadcast %cst_17 : f32 to vector<1x900xf32>
    %133 = vector.extract_strided_slice %130 {offsets = [0, 0], sizes = [1, 1], strides = [1, 1]} : vector<1x2xf32> to vector<1x1xf32>
    %134 = vector.extract_strided_slice %129 {offsets = [0, 0], sizes = [1, 900], strides = [1, 1]} : vector<2x900xf32> to vector<1x900xf32>
    %135 = vector.broadcast %133 : vector<1x1xf32> to vector<1x900xf32>
    %136 = arith.mulf %135, %134 : vector<1x900xf32>
    %137 = arith.addf %132, %136 : vector<1x900xf32>
    %138 = vector.extract_strided_slice %130 {offsets = [0, 1], sizes = [1, 1], strides = [1, 1]} : vector<1x2xf32> to vector<1x1xf32>
    %139 = vector.extract_strided_slice %129 {offsets = [1, 0], sizes = [1, 900], strides = [1, 1]} : vector<2x900xf32> to vector<1x900xf32>
    %140 = vector.broadcast %138 : vector<1x1xf32> to vector<1x900xf32>
    %141 = arith.mulf %140, %139 : vector<1x900xf32>
    %142 = arith.addf %137, %141 : vector<1x900xf32>
    %143 = vector.broadcast %131 : vector<1x1xf32> to vector<1x900xf32>
    %144 = arith.addf %142, %143 : vector<1x900xf32>
    %cst_18 = arith.constant 0.000000e+00 : f32
    %145 = vector.broadcast %cst_18 : f32 to vector<1x900xf32>
    %146 = arith.maximumf %144, %145 : vector<1x900xf32>
    %c0_19 = arith.constant 0 : index
    %c0_20 = arith.constant 0 : index
    %147 = vector.load %arg8[%c0_19, %c0_20] : memref<1x1xf32, #tpu.memory_space<vmem>>, vector<1x1xf32>
    %c0_21 = arith.constant 0 : index
    %c0_22 = arith.constant 0 : index
    %148 = vector.load %arg9[%c0_21, %c0_22] : memref<1x1xf32, #tpu.memory_space<vmem>>, vector<1x1xf32>
    %cst_23 = arith.constant 0.000000e+00 : f32
    %149 = vector.broadcast %cst_23 : f32 to vector<1x900xf32>
    %150 = vector.broadcast %147 : vector<1x1xf32> to vector<1x900xf32>
    %151 = arith.mulf %150, %146 : vector<1x900xf32>
    %152 = arith.addf %149, %151 : vector<1x900xf32>
    %153 = vector.broadcast %148 : vector<1x1xf32> to vector<1x900xf32>
    %154 = arith.addf %152, %153 : vector<1x900xf32>
    %cst_24 = arith.constant 5.000000e-01 : f32
    %155 = vector.broadcast %cst_24 : f32 to vector<1x900xf32>
    %156 = arith.mulf %155, %154 : vector<1x900xf32>
    %157 = math.exp %156 : vector<1x900xf32>
    %158 = arith.mulf %157, %3 : vector<1x900xf32>
    %159 = arith.addf %154, %158 : vector<1x900xf32>
    %c0_25 = arith.constant 0 : index
    %c0_26 = arith.constant 0 : index
    %160 = vector.load %arg10[%c0_25, %c0_26] : memref<2x1xf32, #tpu.memory_space<vmem>>, vector<2x1xf32>
    %c0_27 = arith.constant 0 : index
    %c0_28 = arith.constant 0 : index
    %161 = vector.load %arg11[%c0_27, %c0_28] : memref<2x1xf32, #tpu.memory_space<vmem>>, vector<2x1xf32>
    %cst_29 = arith.constant 0.000000e+00 : f32
    %162 = vector.broadcast %cst_29 : f32 to vector<2x900xf32>
    %163 = vector.broadcast %160 : vector<2x1xf32> to vector<2x900xf32>
    %164 = vector.broadcast %159 : vector<1x900xf32> to vector<2x900xf32>
    %165 = arith.mulf %163, %164 : vector<2x900xf32>
    %166 = arith.addf %162, %165 : vector<2x900xf32>
    %167 = vector.broadcast %161 : vector<2x1xf32> to vector<2x900xf32>
    %168 = arith.addf %166, %167 : vector<2x900xf32>
    %cst_30 = arith.constant 0.000000e+00 : f32
    %169 = vector.broadcast %cst_30 : f32 to vector<2x900xf32>
    %170 = arith.maximumf %168, %169 : vector<2x900xf32>
    %c0_31 = arith.constant 0 : index
    %c0_32 = arith.constant 0 : index
    %171 = vector.load %arg12[%c0_31, %c0_32] : memref<3x2xf32, #tpu.memory_space<vmem>>, vector<3x2xf32>
    %c0_33 = arith.constant 0 : index
    %c0_34 = arith.constant 0 : index
    %172 = vector.load %arg13[%c0_33, %c0_34] : memref<3x1xf32, #tpu.memory_space<vmem>>, vector<3x1xf32>
    %cst_35 = arith.constant 0.000000e+00 : f32
    %173 = vector.broadcast %cst_35 : f32 to vector<3x900xf32>
    %174 = vector.extract_strided_slice %171 {offsets = [0, 0], sizes = [3, 1], strides = [1, 1]} : vector<3x2xf32> to vector<3x1xf32>
    %175 = vector.extract_strided_slice %170 {offsets = [0, 0], sizes = [1, 900], strides = [1, 1]} : vector<2x900xf32> to vector<1x900xf32>
    %176 = vector.broadcast %174 : vector<3x1xf32> to vector<3x900xf32>
    %177 = vector.broadcast %175 : vector<1x900xf32> to vector<3x900xf32>
    %178 = arith.mulf %176, %177 : vector<3x900xf32>
    %179 = arith.addf %173, %178 : vector<3x900xf32>
    %180 = vector.extract_strided_slice %171 {offsets = [0, 1], sizes = [3, 1], strides = [1, 1]} : vector<3x2xf32> to vector<3x1xf32>
    %181 = vector.extract_strided_slice %170 {offsets = [1, 0], sizes = [1, 900], strides = [1, 1]} : vector<2x900xf32> to vector<1x900xf32>
    %182 = vector.broadcast %180 : vector<3x1xf32> to vector<3x900xf32>
    %183 = vector.broadcast %181 : vector<1x900xf32> to vector<3x900xf32>
    %184 = arith.mulf %182, %183 : vector<3x900xf32>
    %185 = arith.addf %179, %184 : vector<3x900xf32>
    %186 = vector.broadcast %172 : vector<3x1xf32> to vector<3x900xf32>
    %187 = arith.addf %185, %186 : vector<3x900xf32>
    %cst_36 = arith.constant 0.000000e+00 : f32
    %188 = vector.broadcast %cst_36 : f32 to vector<3x900xf32>
    %189 = arith.maximumf %187, %188 : vector<3x900xf32>
    %c0_37 = arith.constant 0 : index
    %c0_38 = arith.constant 0 : index
    %190 = vector.load %arg14[%c0_37, %c0_38] : memref<11x3xf32, #tpu.memory_space<vmem>>, vector<11x3xf32>
    %c0_39 = arith.constant 0 : index
    %c0_40 = arith.constant 0 : index
    %191 = vector.load %arg15[%c0_39, %c0_40] : memref<11x1xf32, #tpu.memory_space<vmem>>, vector<11x1xf32>
    %cst_41 = arith.constant 0.000000e+00 : f32
    %192 = vector.broadcast %cst_41 : f32 to vector<11x900xf32>
    %193 = vector.extract_strided_slice %190 {offsets = [0, 0], sizes = [11, 1], strides = [1, 1]} : vector<11x3xf32> to vector<11x1xf32>
    %194 = vector.extract_strided_slice %189 {offsets = [0, 0], sizes = [1, 900], strides = [1, 1]} : vector<3x900xf32> to vector<1x900xf32>
    %195 = vector.broadcast %193 : vector<11x1xf32> to vector<11x900xf32>
    %196 = vector.broadcast %194 : vector<1x900xf32> to vector<11x900xf32>
    %197 = arith.mulf %195, %196 : vector<11x900xf32>
    %198 = arith.addf %192, %197 : vector<11x900xf32>
    %199 = vector.extract_strided_slice %190 {offsets = [0, 1], sizes = [11, 1], strides = [1, 1]} : vector<11x3xf32> to vector<11x1xf32>
    %200 = vector.extract_strided_slice %189 {offsets = [1, 0], sizes = [1, 900], strides = [1, 1]} : vector<3x900xf32> to vector<1x900xf32>
    %201 = vector.broadcast %199 : vector<11x1xf32> to vector<11x900xf32>
    %202 = vector.broadcast %200 : vector<1x900xf32> to vector<11x900xf32>
    %203 = arith.mulf %201, %202 : vector<11x900xf32>
    %204 = arith.addf %198, %203 : vector<11x900xf32>
    %205 = vector.extract_strided_slice %190 {offsets = [0, 2], sizes = [11, 1], strides = [1, 1]} : vector<11x3xf32> to vector<11x1xf32>
    %206 = vector.extract_strided_slice %189 {offsets = [2, 0], sizes = [1, 900], strides = [1, 1]} : vector<3x900xf32> to vector<1x900xf32>
    %207 = vector.broadcast %205 : vector<11x1xf32> to vector<11x900xf32>
    %208 = vector.broadcast %206 : vector<1x900xf32> to vector<11x900xf32>
    %209 = arith.mulf %207, %208 : vector<11x900xf32>
    %210 = arith.addf %204, %209 : vector<11x900xf32>
    %211 = vector.broadcast %191 : vector<11x1xf32> to vector<11x900xf32>
    %212 = arith.addf %210, %211 : vector<11x900xf32>
    %c0_42 = arith.constant 0 : index
    %c0_43 = arith.constant 0 : index
    %c0_44 = arith.constant 0 : index
    %213 = vector.load %arg16[%c0_42, %c0_43, %c0_44] : memref<1x11x900xf32, #tpu.memory_space<vmem>>, vector<1x11x900xf32>
    %214 = vector.shape_cast %213 : vector<1x11x900xf32> to vector<11x900xf32>
    %215 = vector.shape_cast %212 : vector<11x900xf32> to vector<1x11x900xf32>
    tpu.vector_store %arg16[%c0_42, %c0_43, %c0_44], %215 {strides = array<i32>} : memref<1x11x900xf32, #tpu.memory_space<vmem>>, vector<1x11x900xf32>,
    return
  }
  func.func @transform_0(%arg0: i32) -> (i32, i32, i32) {
    %c0_i32 = arith.constant 0 : i32
    %c0_i32_0 = arith.constant 0 : i32
    %c0_i32_1 = arith.constant 0 : i32
    return %arg0, %c0_i32, %c0_i32_0 : i32, i32, i32
  }
  func.func @transform_1(%arg0: i32) -> (i32, i32, i32) {
    %c0_i32 = arith.constant 0 : i32
    %c0_i32_0 = arith.constant 0 : i32
    %c0_i32_1 = arith.constant 0 : i32
    return %arg0, %c0_i32, %c0_i32_0 : i32, i32, i32
  }
  func.func @transform_2(%arg0: i32) -> (i32, i32) {
    %c0_i32 = arith.constant 0 : i32
    %c0_i32_0 = arith.constant 0 : i32
    %c0_i32_1 = arith.constant 0 : i32
    return %c0_i32, %c0_i32_0 : i32, i32
  }
  func.func @transform_3(%arg0: i32) -> (i32, i32) {
    %c0_i32 = arith.constant 0 : i32
    %c0_i32_0 = arith.constant 0 : i32
    %c0_i32_1 = arith.constant 0 : i32
    return %c0_i32, %c0_i32_0 : i32, i32
  }
  func.func @transform_4(%arg0: i32) -> (i32, i32) {
    %c0_i32 = arith.constant 0 : i32
    %c0_i32_0 = arith.constant 0 : i32
    %c0_i32_1 = arith.constant 0 : i32
    return %c0_i32, %c0_i32_0 : i32, i32
  }
  func.func @transform_5(%arg0: i32) -> (i32, i32) {
    %c0_i32 = arith.constant 0 : i32
    %c0_i32_0 = arith.constant 0 : i32
    %c0_i32_1 = arith.constant 0 : i32
    return %c0_i32, %c0_i32_0 : i32, i32
  }
  func.func @transform_6(%arg0: i32) -> (i32, i32) {
    %c0_i32 = arith.constant 0 : i32
    %c0_i32_0 = arith.constant 0 : i32
    %c0_i32_1 = arith.constant 0 : i32
    return %c0_i32, %c0_i32_0 : i32, i32
  }
  func.func @transform_7(%arg0: i32) -> (i32, i32) {
    %c0_i32 = arith.constant 0 : i32
    %c0_i32_0 = arith.constant 0 : i32
    %c0_i32_1 = arith.constant 0 : i32
    return %c0_i32, %c0_i32_0 : i32, i32
  }
  func.func @transform_8(%arg0: i32) -> (i32, i32) {
    %c0_i32 = arith.constant 0 : i32
    %c0_i32_0 = arith.constant 0 : i32
    %c0_i32_1 = arith.constant 0 : i32
    return %c0_i32, %c0_i32_0 : i32, i32
  }
  func.func @transform_9(%arg0: i32) -> (i32, i32) {
    %c0_i32 = arith.constant 0 : i32
    %c0_i32_0 = arith.constant 0 : i32
    %c0_i32_1 = arith.constant 0 : i32
    return %c0_i32, %c0_i32_0 : i32, i32
  }
  func.func @transform_10(%arg0: i32) -> (i32, i32) {
    %c0_i32 = arith.constant 0 : i32
    %c0_i32_0 = arith.constant 0 : i32
    %c0_i32_1 = arith.constant 0 : i32
    return %c0_i32, %c0_i32_0 : i32, i32
  }
  func.func @transform_11(%arg0: i32) -> (i32, i32) {
    %c0_i32 = arith.constant 0 : i32
    %c0_i32_0 = arith.constant 0 : i32
    %c0_i32_1 = arith.constant 0 : i32
    return %c0_i32, %c0_i32_0 : i32, i32
  }
  func.func @transform_12(%arg0: i32) -> (i32, i32) {
    %c0_i32 = arith.constant 0 : i32
    %c0_i32_0 = arith.constant 0 : i32
    %c0_i32_1 = arith.constant 0 : i32
    return %c0_i32, %c0_i32_0 : i32, i32
  }
  func.func @transform_13(%arg0: i32) -> (i32, i32) {
    %c0_i32 = arith.constant 0 : i32
    %c0_i32_0 = arith.constant 0 : i32
    %c0_i32_1 = arith.constant 0 : i32
    return %c0_i32, %c0_i32_0 : i32, i32
  }
  func.func @transform_14(%arg0: i32) -> (i32, i32) {
    %c0_i32 = arith.constant 0 : i32
    %c0_i32_0 = arith.constant 0 : i32
    %c0_i32_1 = arith.constant 0 : i32
    return %c0_i32, %c0_i32_0 : i32, i32
  }
  func.func @transform_15(%arg0: i32) -> (i32, i32, i32) {
    %c0_i32 = arith.constant 0 : i32
    %c0_i32_0 = arith.constant 0 : i32
    %c0_i32_1 = arith.constant 0 : i32
    return %arg0, %c0_i32, %c0_i32_0 : i32, i32, i32
  }
}

</mosaic_0001>

<bundles_post_ra>
// kernel: forward.1
= control target key start
LH: loop header
LB: loop body
LE: loop exit
PB: predicated region body
PF: predicated region fallthrough
CT: control target
= control target key end

     0   :  { %s2356_s24 = smov 0   ;;  %s3183_s0 = inlined_call_operand.vmem [shape: s32[2,1,900], index: 0, kind: input, shape index: {}]   ;;  %s3184_s1 = inlined_call_operand.vmem [shape: f32[2,1,900], index: 1, kind: input, shape index: {}]   ;;  %s3185_s2 = inlined_call_operand.vmem [shape: f32[3,11], index: 2, kind: input, shape index: {}]   ;;  %s3186_s3 = inlined_call_operand.vmem [shape: f32[2,3], index: 3, kind: input, shape index: {}]   ;;  %s3187_s4 = inlined_call_operand.vmem [shape: f32[2,1], index: 4, kind: input, shape index: {}]   ;;  %s3188_s5 = inlined_call_operand.vmem [shape: f32[1,2], index: 5, kind: input, shape index: {}]   ;;  %s3189_s6 = inlined_call_operand.<no memory space> [shape: f32[1,1], index: 6, kind: input, shape index: {}]   ;;  %s3190_s9 = inlined_call_operand.vmem [shape: f32[2,1], index: 9, kind: input, shape index: {}]   ;;  %s3191_s10 = inlined_call_operand.vmem [shape: f32[2,1], index: 10, kind: input, shape index: {}]   ;;  %s3192_s11 = inlined_call_operand.vmem [shape: f32[3,2], index: 11, kind: input, shape index: {}]   ;;  %s3193_s12 = inlined_call_operand.vmem [shape: f32[3,1], index: 12, kind: input, shape index: {}]   ;;  %s3194_s13 = inlined_call_operand.vmem [shape: f32[11,3], index: 13, kind: input, shape index: {}]   ;;  %s3195_s14 = inlined_call_operand.vmem [shape: f32[11,1], index: 14, kind: input, shape index: {}]   ;;  %s3196_s15 = inlined_call_operand.vmem [shape: f32[2,11,900], index: 15, kind: output, shape index: {}]   ;;  %s3197_s7 = inlined_call_operand.<no memory space> [shape: f32[1,1], index: 7, kind: input, shape index: {}]   ;;  %s3198_s8 = inlined_call_operand.<no memory space> [shape: f32[1,1], index: 8, kind: input, shape index: {}]  }
   0x1   :  { %v20_v0 = vstv %s3189_s6  ;;  %v22_v1 = vstv %s3197_s7  ;;  %v24_v2 = vstv %s3198_s8 }
   0x2   :  { %21 = vst [vmem:[#allocation2] sm:$0x1] %v20_v0  ;;  %23 = vst [vmem:[#allocation3] sm:$0x1] %v22_v1 }
   0x3   :  { %25 = vst [vmem:[#allocation4] sm:$0x1] %v24_v2 }
   0x4 LB: > { %s2165_s6 = sadd.s32 4294967295, %s2253_s24   ;;  %p2169_p0 = scmp.ge.s32.totalorder %s2253_s24, 1  ;;  %s2253_s24 = sphi %s2356_s24, %s31_s24  }
   0x5   : > { %p451_p1 = scmp.lt.s32.totalorder %s2253_s24, 3 }
   0x7   : > { %p452_p2 = pnand %p2169_p0, %p451_p1 }
   0x9   : > { %455 = sbr.rel (%p452_p2) target bundleno = 317 (0x13d), region = 80 }
   0xe   : > { %v517_v3 = vld [vmem:[%s3185_s2] sm:$0x7]  ;;  %v2255_v4 = vmov 2   ;;  %v2256_v5 = vmov 0   ;;  %v2257_v6 = vmov 3   ;;  %v2258_v7 = vmov 1  }
   0xf   : > { %2210 = vset.pattern.permute.xlu1 %v2255_v4  ;;  %2208 = vset.pattern.permute.xlu0 %v2256_v5  ;;  %v2259_v8 = vmov 4   ;;  %v2260_v9 = vmov 5   ;;  %v2261_v10 = vmov 6   ;;  %v2262_v11 = vmov 8   ;;  %v1223_v12 = vld [vmem:[%s3186_s3] sm:$0x3] }
  0x10   : > { %651 = vperm.xlu1 %2210, %v517_v3   ;;  %523 = vperm.xlu0 %2208, %v517_v3   ;;  %v2263_v13 = vmov 7   ;;  %v1224_v14 = vld [vmem:[%s3187_s4] sm:$0x3]  ;;  %v2264_v15 = vmov 9   ;;  %v2265_v17 = vmov 10   ;;  %p502_p3 = scmp.lt.s32.totalorder %s2165_s6, 1  ;;  %v527_v29 = vlaneseq }
  0x11   : > { %v1403_v16 = vld [vmem:[%s3188_s5] sm:$0x1]  ;;  %v1503_v18 = vld [vmem:[#allocation3] sm:$0x1]  ;;  %v1833_v22 = vld [vmem:[%s3194_s13 + $0x8] sm:$0x7] }
  0x12   : > { %v1628_v19 = vld [vmem:[%s3190_s9] sm:$0x3]  ;;  %v1504_v24 = vld [vmem:[#allocation4] sm:$0x1]  ;;  %s3271_s6 = smov (!%p502_p3, %s2165_s6), 1  ;;  %v528_v30 = vshrl.u32 %v527_v29, 7 }
  0x13   : > { %v1704_v20 = vld [vmem:[%s3192_s11] sm:$0x7]  ;;  %v1835_v28 = vld [vmem:[%s3195_s14 + $0x8] sm:$0x7]  ;;  %s2170_s16 = sshll.u32 %s3271_s6, 3  ;;  %v2266_v40 = vmov 0.0  }
  0x14   : > { %2211 = vset.pattern.permute.xlu1 %v2257_v6  ;;  %2209 = vset.pattern.permute.xlu0 %v2258_v7  ;;  %v1705_v21 = vld [vmem:[%s3193_s12] sm:$0x7]  ;;  %s505_s19 = scalar_lea.vmem %s3183_s0, %s2170_s16  ;;  %v2430_v32 = vsub.s32 0, %v528_v30  ;;  %v2432_v33 = vsub.s32 1, %v528_v30  ;;  %v2434_v34 = vsub.s32 2, %v528_v30  ;;  %v2436_v35 = vsub.s32 3, %v528_v30  ;;  %s509_s22 = scalar_lea.vmem %s3184_s1, %s2170_s16 }
  0x15   : > { %715 = vperm.xlu1 %2211, %v517_v3   ;;  %587 = vperm.xlu0 %2209, %v517_v3   ;;  %v1404_v23 = vld [vmem:[#allocation2] sm:$0x1]  ;;  %v2438_v36 = vsub.s32 4, %v528_v30  ;;  %v2443_v37 = vsub.s32 5, %v528_v30  ;;  %v2445_v38 = vsub.s32 6, %v528_v30  ;;  %v2447_v39 = vsub.s32 7, %v528_v30 }
  0x16   : > { %v1629_v25 = vld [vmem:[%s3191_s10] sm:$0x3]  ;;  %vm2096_vm11 = vcmask 26624   ;;  %s2187_s23 = sshll.u32 %s3271_s6, 7  ;;  %vm2087_vm12 = vcmask 31744  }
  0x17   : > { %v1834_v26 = vld [vmem:[%s3195_s14] sm:$0xff]  ;;  %s3136_s25 = scalar_lea.vmem %s3196_s15, %s2187_s23 }
  0x18   : > { %v1832_v27 = vld [vmem:[%s3194_s13] sm:$0xff] }
  0x19   : > { %2212 = vset.pattern.permute.xlu1 %v2259_v8  ;;  %2213 = vset.pattern.permute.xlu0 %v2260_v9  ;;  %v2427_v31 = vld [vmem:[%s505_s19] sm:$0xff] }
  0x1a   : > { %779 = vperm.xlu1 %2212, %v517_v3   ;;  %843 = vperm.xlu0 %2213, %v517_v3   ;;  %vm647_vm0 = vcmp.eq.s32.totalorder %v2427_v31, 2  ;;  %vm518_vm1 = vcmp.eq.s32.totalorder %v2427_v31, 0  ;;  %vm711_vm2 = vcmp.eq.s32.totalorder %v2427_v31, 3  ;;  %vm583_vm3 = vcmp.eq.s32.totalorder %v2427_v31, 1 }
  0x1b   : > { %v2450_v41 = vsel %vm647_vm0, 1.0, %v2266_v40  ;;  %v2453_v42 = vsel %vm518_vm1, 1.0, %v2266_v40  ;;  %v2456_v43 = vsel %vm711_vm2, 1.0, %v2266_v40  ;;  %v2459_v44 = vsel %vm583_vm3, 1.0, %v2266_v40 }
  0x1c   : > { %vm775_vm4 = vcmp.eq.s32.totalorder %v2427_v31, 4  ;;  %v658_v45 = vrot.slane %v2450_v41, %v2430_v32  ;;  %v662_v46 = vrot.slane %v2450_v41, %v2432_v33  ;;  %v666_v47 = vrot.slane %v2450_v41, %v2434_v34 }
  0x1d   : > { %v670_v48 = vrot.slane %v2450_v41, %v2436_v35  ;;  %v674_v49 = vrot.slane %v2450_v41, %v2438_v36  ;;  %v678_v50 = vrot.slane %v2450_v41, %v2443_v37  ;;  %v682_v51 = vrot.slane %v2450_v41, %v2445_v38 }
  0x1e   : > { %2214 = vset.pattern.permute.xlu1 %v2261_v10  ;;  %2216 = vset.pattern.permute.xlu0 %v2262_v11  ;;  %v686_v52 = vrot.slane %v2450_v41, %v2447_v39  ;;  %v530_v53 = vrot.slane %v2453_v42, %v2430_v32  ;;  %v534_v54 = vrot.slane %v2453_v42, %v2432_v33  ;;  %v2485_v56 = vsel %vm775_vm4, 1.0, %v2266_v40 }
  0x1f   : > { %907 = vperm.xlu1 %2214, %v517_v3   ;;  %1035 = vperm.xlu0 %2216, %v517_v3   ;;  %v538_v55 = vrot.slane %v2453_v42, %v2434_v34  ;;  %v542_v57 = vrot.slane %v2453_v42, %v2436_v35  ;;  %v546_v58 = vrot.slane %v2453_v42, %v2438_v36  ;;  %vm839_vm5 = vcmp.eq.s32.totalorder %v2427_v31, 5 }
  0x20   : > { %v550_v59 = vrot.slane %v2453_v42, %v2443_v37  ;;  %v554_v60 = vrot.slane %v2453_v42, %v2445_v38  ;;  %v558_v61 = vrot.slane %v2453_v42, %v2447_v39  ;;  %v722_v62 = vrot.slane %v2456_v43, %v2430_v32 }
  0x21   : > { %v726_v63 = vrot.slane %v2456_v43, %v2432_v33  ;;  %v730_v0 = vrot.slane %v2456_v43, %v2434_v34  ;;  %v734_v1 = vrot.slane %v2456_v43, %v2436_v35  ;;  %v738_v2 = vrot.slane %v2456_v43, %v2438_v36 }
  0x22   : > { %v594_v6 = vrot.slane %v2459_v44, %v2430_v32  ;;  %v602_v8 = vrot.slane %v2459_v44, %v2434_v34  ;;  %v606_v9 = vrot.slane %v2459_v44, %v2436_v35  ;;  %v610_v10 = vrot.slane %v2459_v44, %v2438_v36 }
  0x23   : > { %2215 = vset.pattern.permute.xlu1 %v2263_v13  ;;  %2219 = vset.pattern.permute.xlu0 %v2256_v5  ;;  %v2525_v11 = vsel %vm839_vm5, 1.0, %v2266_v40  ;;  %v618_v13 = vrot.slane %v2459_v44, %v2445_v38  ;;  %vm903_vm6 = vcmp.eq.s32.totalorder %v2427_v31, 6  ;;  %vm1031_vm7 = vcmp.eq.s32.totalorder %v2427_v31, 8 }
  0x24   : > { %971 = vperm.xlu1 %2215, %v517_v3   ;;  %1227 = vperm.xlu0 %2219, %v1223_v12   ;;  %vm967_vm8 = vcmp.eq.s32.totalorder %v2427_v31, 7  ;;  %vm1095_vm9 = vcmp.eq.s32.totalorder %v2427_v31, 9  ;;  %vm1159_vm10 = vcmp.eq.s32.totalorder %v2427_v31, 10 }
  0x28   : > { %2217 = vset.pattern.permute.xlu1 %v2264_v15  ;;  %1384 = vperm.xlu0 %2219, %v1224_v14   ;;  %v622_v14 = vrot.slane %v2459_v44, %v2447_v39 }
  0x29   : > { %1099 = vperm.xlu1 %2217, %v517_v3  }
  0x2c   : > { %1407 = vperm.xlu0 %2219, %v1403_v16  }
  0x2d   : > { %2218 = vset.pattern.permute.xlu1 %v2265_v17 }
  0x2e   : > { %1163 = vperm.xlu1 %2218, %v517_v3   ;;  %v742_v3 = vrot.slane %v2456_v43, %v2443_v37 }
  0x30   : > { %1507 = vperm.xlu0 %2219, %v1503_v18  }
  0x32   : > { %2220 = vset.pattern.permute.xlu1 %v2258_v7 }
  0x33   : > { %1279 = vperm.xlu1 %2220, %v1223_v12  }
  0x34   : > { %1632 = vperm.xlu0 %2219, %v1628_v19  }
  0x37   : > { %2221 = vset.pattern.permute.xlu1 %v2255_v4 }
  0x38   : > { %1331 = vperm.xlu1 %2221, %v1223_v12   ;;  %1708 = vperm.xlu0 %2219, %v1704_v20   ;;  %v614_v12 = vrot.slane %v2459_v44, %v2443_v37 }
  0x3c   : > { %2222 = vset.pattern.permute.xlu1 %v2258_v7  ;;  %1813 = vperm.xlu0 %2219, %v1705_v21   ;;  %v2612_v21 = vsel %vm1095_vm9, 1.0, %v2266_v40 }
  0x3d   : > { %1431 = vperm.xlu1 %2222, %v1403_v16   ;;  %3209 = vst [vmem:[#allocation7_spill] sm:$0xff] %v2612_v21 }
  0x40   : > { %1843 = vperm.xlu0 %2219, %v1833_v22  }
  0x41   : > { %2223 = vset.pattern.permute.xlu1 %v2256_v5 }
  0x42   : > { %1480 = vperm.xlu1 %2223, %v1404_v23   ;;  %v2571_v23 = vsel %vm1031_vm7, 1.0, %v2266_v40 }
  0x43   : > { %3207 = vst [vmem:[#allocation5_spill] sm:$0xff] %v2571_v23 }
  0x44   : > { %2227 = vset.pattern.permute.xlu0 %v2258_v7 }
  0x45   : > { %1915 = vperm.xlu0 %2227, %v1833_v22  }
  0x46   : > { %1532 = vperm.xlu1 %2223, %v1504_v24  }
  0x49   : > { %2229 = vset.pattern.permute.xlu0 %v2256_v5 }
  0x4a   : > { %1685 = vperm.xlu1 %2223, %v1629_v25   ;;  %2056 = vperm.xlu0 %2229, %v1834_v26   ;;  %v2556_v25 = vsel %vm903_vm6, 1.0, %v2266_v40 }
  0x4e   : > { %2224 = vset.pattern.permute.xlu1 %v2258_v7 }
  0x4f   : > { %1760 = vperm.xlu1 %2224, %v1704_v20  }
  0x53   : > { %2225 = vset.pattern.permute.xlu1 %v2256_v5 }
  0x54   : > { %1838 = vperm.xlu1 %2225, %v1832_v27  }
  0x58   : > { %2226 = vset.pattern.permute.xlu1 %v2258_v7  ;;  %v598_v7 = vrot.slane %v2459_v44, %v2432_v33 }
  0x59   : > { %1911 = vperm.xlu1 %2226, %v1832_v27  }
  0x5d   : > { %2228 = vset.pattern.permute.xlu1 %v2255_v4  ;;  %v746_v4 = vrot.slane %v2456_v43, %v2445_v38 }
  0x5e   : > { %1983 = vperm.xlu1 %2228, %v1832_v27   ;;  %v2596_v27 = vsel %vm967_vm8, 1.0, %v2266_v40 }
  0x5f   : > { %3208 = vst [vmem:[#allocation6_spill] sm:$0xff] %v2596_v27 }
  0x62   : > { %1987 = vperm.xlu1 %2228, %v1833_v22   ;;  %v2629_v22 = vsel %vm1159_vm10, 1.0, %v2266_v40 }
  0x63   : > { %3210 = vst [vmem:[#allocation8_spill] sm:$0xff] %v2629_v22 }
  0x66   : > { %2230 = vset.pattern.permute.xlu1 %v2256_v5  ;;  %v750_v5 = vrot.slane %v2456_v43, %v2447_v39 }
  0x67   : > { %2061 = vperm.xlu1 %2230, %v1835_v28  }
  0x8b   : > { %v652_v20 = vpop.permute.xlu1 %651  ;;  %v524_v31 = vpop.permute.xlu0 %523 }
  0x8c   : > { %v695_v30 = vmul.f32 %v658_v45, %v652_v20  ;;  %v696_v26 = vmul.f32 %v662_v46, %v652_v20  ;;  %v697_v40 = vmul.f32 %v666_v47, %v652_v20  ;;  %v698_v24 = vmul.f32 %v670_v48, %v652_v20 }
  0x8d   : > { %v699_v29 = vmul.f32 %v674_v49, %v652_v20  ;;  %v700_v45 = vmul.f32 %v678_v50, %v652_v20  ;;  %v701_v46 = vmul.f32 %v682_v51, %v652_v20  ;;  %v702_v47 = vmul.f32 %v686_v52, %v652_v20 }
  0x8e   : > { %v567_v48 = vmul.f32 %v530_v53, %v524_v31  ;;  %v568_v49 = vmul.f32 %v534_v54, %v524_v31  ;;  %v569_v50 = vmul.f32 %v538_v55, %v524_v31  ;;  %v570_v51 = vmul.f32 %v542_v57, %v524_v31 }
  0x8f   : > { %v571_v41 = vmul.f32 %v546_v58, %v524_v31  ;;  %v572_v52 = vmul.f32 %v550_v59, %v524_v31  ;;  %v573_v53 = vmul.f32 %v554_v60, %v524_v31  ;;  %v574_v54 = vmul.f32 %v558_v61, %v524_v31 }
  0x90   : > { %v716_v55 = vpop.permute.xlu1 %715  ;;  %v588_v20 = vpop.permute.xlu0 %587 }
  0x91   : > { %v759_v57 = vmul.f32 %v722_v62, %v716_v55  ;;  %v760_v58 = vmul.f32 %v726_v63, %v716_v55  ;;  %v761_v59 = vmul.f32 %v730_v0, %v716_v55  ;;  %v762_v60 = vmul.f32 %v734_v1, %v716_v55 }
  0x92   : > { %v763_v42 = vmul.f32 %v738_v2, %v716_v55  ;;  %v764_v61 = vmul.f32 %v742_v3, %v716_v55  ;;  %v765_v62 = vmul.f32 %v746_v4, %v716_v55  ;;  %v766_v63 = vmul.f32 %v750_v5, %v716_v55 }
  0x93   : > { %v631_v0 = vmul.f32 %v594_v6, %v588_v20  ;;  %v632_v1 = vmul.f32 %v598_v7, %v588_v20  ;;  %v633_v2 = vmul.f32 %v602_v8, %v588_v20  ;;  %v634_v3 = vmul.f32 %v606_v9, %v588_v20 }
  0x94   : > { %v635_v43 = vmul.f32 %v610_v10, %v588_v20  ;;  %v636_v4 = vmul.f32 %v614_v12, %v588_v20  ;;  %v637_v5 = vmul.f32 %v618_v13, %v588_v20  ;;  %v638_v6 = vmul.f32 %v622_v14, %v588_v20 }
  0x95   : > { %v639_v7 = vadd.f32 %v631_v0, %v567_v48  ;;  %v640_v8 = vadd.f32 %v632_v1, %v568_v49  ;;  %v641_v31 = vadd.f32 %v633_v2, %v569_v50  ;;  %v642_v9 = vadd.f32 %v634_v3, %v570_v51  ;;  %v780_v15 = vpop.permute.xlu1 %779 }
  0x96   : > { %v643_v55 = vadd.f32 %v635_v43, %v571_v41  ;;  %v644_v19 = vadd.f32 %v636_v4, %v572_v52  ;;  %v645_v28 = vadd.f32 %v637_v5, %v573_v53  ;;  %v646_v10 = vadd.f32 %v638_v6, %v574_v54 }
  0x97   : > { %v703_v18 = vadd.f32 %v695_v30, %v639_v7  ;;  %v704_v17 = vadd.f32 %v696_v26, %v640_v8  ;;  %v705_v16 = vadd.f32 %v697_v40, %v641_v31  ;;  %v706_v12 = vadd.f32 %v698_v24, %v642_v9 }
  0x98   : > { %v707_v22 = vadd.f32 %v699_v29, %v643_v55  ;;  %v708_v21 = vadd.f32 %v700_v45, %v644_v19  ;;  %v709_v13 = vadd.f32 %v701_v46, %v645_v28  ;;  %v710_v27 = vadd.f32 %v702_v47, %v646_v10  ;;  %v844_v47 = vpop.permute.xlu0 %843 }
  0x99   : > { %v767_v23 = vadd.f32 %v759_v57, %v703_v18  ;;  %v768_v44 = vadd.f32 %v760_v58, %v704_v17  ;;  %v769_v14 = vadd.f32 %v761_v59, %v705_v16  ;;  %v770_v48 = vadd.f32 %v762_v60, %v706_v12 }
  0x9a   : > { %v771_v49 = vadd.f32 %v763_v42, %v707_v22  ;;  %v772_v50 = vadd.f32 %v764_v61, %v708_v21  ;;  %v773_v51 = vadd.f32 %v765_v62, %v709_v13  ;;  %v774_v41 = vadd.f32 %v766_v63, %v710_v27  ;;  %v908_v58 = vpop.permute.xlu1 %907 }
  0x9b   : > { %v3211_v52 = vrot.slane %v2485_v56, %v2430_v32  ;;  %v3212_v24 = vrot.slane %v2485_v56, %v2432_v33  ;;  %v3213_v19 = vrot.slane %v2485_v56, %v2434_v34  ;;  %v3214_v16 = vrot.slane %v2485_v56, %v2436_v35 }
  0x9c   : > { %v3215_v18 = vrot.slane %v2485_v56, %v2438_v36  ;;  %v3216_v22 = vrot.slane %v2485_v56, %v2443_v37  ;;  %v3217_v29 = vrot.slane %v2485_v56, %v2445_v38  ;;  %v3218_v45 = vrot.slane %v2485_v56, %v2447_v39 }
  0x9d   : > { %v823_v30 = vmul.f32 %v3211_v52, %v780_v15  ;;  %v824_v26 = vmul.f32 %v3212_v24, %v780_v15  ;;  %v825_v28 = vmul.f32 %v3213_v19, %v780_v15  ;;  %v826_v17 = vmul.f32 %v3214_v16, %v780_v15 }
  0x9e   : > { %v827_v21 = vmul.f32 %v3215_v18, %v780_v15  ;;  %v828_v27 = vmul.f32 %v3216_v22, %v780_v15  ;;  %v829_v40 = vmul.f32 %v3217_v29, %v780_v15  ;;  %v830_v46 = vmul.f32 %v3218_v45, %v780_v15  ;;  %v1036_v29 = vpop.permute.xlu0 %1035 }
  0x9f   : > { %v831_v53 = vadd.f32 %v823_v30, %v767_v23  ;;  %v832_v54 = vadd.f32 %v824_v26, %v768_v44  ;;  %v833_v20 = vadd.f32 %v825_v28, %v769_v14  ;;  %v834_v57 = vadd.f32 %v826_v17, %v770_v48  ;;  %v972_v26 = vpop.permute.xlu1 %971 }
  0xa0   : > { %v835_v59 = vadd.f32 %v827_v21, %v771_v49  ;;  %v836_v60 = vadd.f32 %v828_v27, %v772_v50  ;;  %v837_v42 = vadd.f32 %v829_v40, %v773_v51  ;;  %v838_v61 = vadd.f32 %v830_v46, %v774_v41 }
  0xa1   : > { %v3219_v62 = vrot.slane %v2525_v11, %v2430_v32  ;;  %v3220_v0 = vrot.slane %v2525_v11, %v2432_v33  ;;  %v3221_v56 = vrot.slane %v2525_v11, %v2434_v34  ;;  %v3222_v23 = vrot.slane %v2525_v11, %v2436_v35 }
  0xa2   : > { %v3223_v3 = vrot.slane %v2525_v11, %v2438_v36  ;;  %v3224_v4 = vrot.slane %v2525_v11, %v2443_v37  ;;  %v3225_v6 = vrot.slane %v2525_v11, %v2445_v38  ;;  %v3226_v8 = vrot.slane %v2525_v11, %v2447_v39 }
  0xa3   : > { %v887_v63 = vmul.f32 %v3219_v62, %v844_v47  ;;  %v888_v1 = vmul.f32 %v3220_v0, %v844_v47  ;;  %v889_v15 = vmul.f32 %v3221_v56, %v844_v47  ;;  %v890_v2 = vmul.f32 %v3222_v23, %v844_v47 }
  0xa4   : > { %v891_v43 = vmul.f32 %v3223_v3, %v844_v47  ;;  %v892_v5 = vmul.f32 %v3224_v4, %v844_v47  ;;  %v893_v7 = vmul.f32 %v3225_v6, %v844_v47  ;;  %v894_v31 = vmul.f32 %v3226_v8, %v844_v47 }
  0xa5   : > { %v895_v9 = vadd.f32 %v887_v63, %v831_v53  ;;  %v896_v55 = vadd.f32 %v888_v1, %v832_v54  ;;  %v897_v10 = vadd.f32 %v889_v15, %v833_v20  ;;  %v898_v12 = vadd.f32 %v890_v2, %v834_v57 }
  0xa6   : > { %v899_v13 = vadd.f32 %v891_v43, %v835_v59  ;;  %v900_v44 = vadd.f32 %v892_v5, %v836_v60  ;;  %v901_v14 = vadd.f32 %v893_v7, %v837_v42  ;;  %v902_v48 = vadd.f32 %v894_v31, %v838_v61  ;;  %v3235_v59 = vld [vmem:[#allocation5_spill] sm:$0xff]  ;;  %v3244_v5 = vld [vmem:[#allocation6_spill] sm:$0xff] }
  0xa7   : > { %v3227_v49 = vrot.slane %v2556_v25, %v2430_v32  ;;  %v3228_v51 = vrot.slane %v2556_v25, %v2432_v33  ;;  %v3229_v11 = vrot.slane %v2556_v25, %v2434_v34  ;;  %v3230_v30 = vrot.slane %v2556_v25, %v2436_v35 }
  0xa8   : > { %v3231_v19 = vrot.slane %v2556_v25, %v2438_v36  ;;  %v3232_v16 = vrot.slane %v2556_v25, %v2443_v37  ;;  %v3233_v18 = vrot.slane %v2556_v25, %v2445_v38  ;;  %v3234_v22 = vrot.slane %v2556_v25, %v2447_v39 }
  0xa9   : > { %v951_v50 = vmul.f32 %v3227_v49, %v908_v58  ;;  %v952_v41 = vmul.f32 %v3228_v51, %v908_v58  ;;  %v953_v52 = vmul.f32 %v3229_v11, %v908_v58  ;;  %v954_v24 = vmul.f32 %v3230_v30, %v908_v58 }
  0xaa   : > { %v955_v28 = vmul.f32 %v3231_v19, %v908_v58  ;;  %v956_v17 = vmul.f32 %v3232_v16, %v908_v58  ;;  %v957_v21 = vmul.f32 %v3233_v18, %v908_v58  ;;  %v958_v27 = vmul.f32 %v3234_v22, %v908_v58 }
  0xab   : > { %v959_v40 = vadd.f32 %v951_v50, %v895_v9  ;;  %v960_v45 = vadd.f32 %v952_v41, %v896_v55  ;;  %v961_v46 = vadd.f32 %v953_v52, %v897_v10  ;;  %v962_v47 = vadd.f32 %v954_v24, %v898_v12  ;;  %v2879_v52 = vpop.permute.xlu0 %1227 }
  0xac   : > { %v963_v53 = vadd.f32 %v955_v28, %v899_v13  ;;  %v964_v54 = vadd.f32 %v956_v17, %v900_v44  ;;  %v965_v20 = vadd.f32 %v957_v21, %v901_v14  ;;  %v966_v57 = vadd.f32 %v958_v27, %v902_v48  ;;  %v1100_v13 = vpop.permute.xlu1 %1099 }
  0xad   : > { %v3236_v60 = vrot.slane %v3235_v59, %v2430_v32  ;;  %v3237_v61 = vrot.slane %v3235_v59, %v2432_v33  ;;  %v3238_v25 = vrot.slane %v3235_v59, %v2434_v34  ;;  %v3239_v63 = vrot.slane %v3235_v59, %v2436_v35 }
  0xae   : > { %v3240_v1 = vrot.slane %v3235_v59, %v2438_v36  ;;  %v3241_v15 = vrot.slane %v3235_v59, %v2443_v37  ;;  %v3242_v2 = vrot.slane %v3235_v59, %v2445_v38  ;;  %v3243_v43 = vrot.slane %v3235_v59, %v2447_v39 }
  0xaf   : > { %v1079_v42 = vmul.f32 %v3236_v60, %v1036_v29  ;;  %v1080_v62 = vmul.f32 %v3237_v61, %v1036_v29  ;;  %v1081_v58 = vmul.f32 %v3238_v25, %v1036_v29  ;;  %v1082_v0 = vmul.f32 %v3239_v63, %v1036_v29 }
  0xb0   : > { %v1083_v56 = vmul.f32 %v3240_v1, %v1036_v29  ;;  %v1084_v23 = vmul.f32 %v3241_v15, %v1036_v29  ;;  %v1085_v3 = vmul.f32 %v3242_v2, %v1036_v29  ;;  %v1086_v4 = vmul.f32 %v3243_v43, %v1036_v29  ;;  %v3253_v1 = vld [vmem:[#allocation7_spill] sm:$0xff] }
  0xb1   : > { %v3245_v6 = vrot.slane %v3244_v5, %v2430_v32  ;;  %v3246_v8 = vrot.slane %v3244_v5, %v2432_v33  ;;  %v3247_v9 = vrot.slane %v3244_v5, %v2434_v34  ;;  %v3248_v10 = vrot.slane %v3244_v5, %v2436_v35 }
  0xb2   : > { %v3249_v44 = vrot.slane %v3244_v5, %v2438_v36  ;;  %v3250_v48 = vrot.slane %v3244_v5, %v2443_v37  ;;  %v3251_v50 = vrot.slane %v3244_v5, %v2445_v38  ;;  %v3252_v41 = vrot.slane %v3244_v5, %v2447_v39 }
  0xb3   : > { %v1015_v7 = vmul.f32 %v3245_v6, %v972_v26  ;;  %v1016_v31 = vmul.f32 %v3246_v8, %v972_v26  ;;  %v1017_v55 = vmul.f32 %v3247_v9, %v972_v26  ;;  %v1018_v12 = vmul.f32 %v3248_v10, %v972_v26  ;;  %v3262_v6 = vld [vmem:[#allocation8_spill] sm:$0xff] }
  0xb4   : > { %v1019_v14 = vmul.f32 %v3249_v44, %v972_v26  ;;  %v1020_v49 = vmul.f32 %v3250_v48, %v972_v26  ;;  %v1021_v51 = vmul.f32 %v3251_v50, %v972_v26  ;;  %v1022_v11 = vmul.f32 %v3252_v41, %v972_v26 }
  0xb5   : > { %v1023_v30 = vadd.f32 %v1015_v7, %v959_v40  ;;  %v1024_v24 = vadd.f32 %v1016_v31, %v960_v45  ;;  %v1025_v19 = vadd.f32 %v1017_v55, %v961_v46  ;;  %v1026_v28 = vadd.f32 %v1018_v12, %v962_v47 }
  0xb6   : > { %v1027_v16 = vadd.f32 %v1019_v14, %v963_v53  ;;  %v1028_v17 = vadd.f32 %v1020_v49, %v964_v54  ;;  %v1029_v18 = vadd.f32 %v1021_v51, %v965_v20  ;;  %v1030_v21 = vadd.f32 %v1022_v11, %v966_v57  ;;  %v1164_v20 = vpop.permute.xlu1 %1163  ;;  %v2893_v57 = vpop.permute.xlu0 %1384 }
  0xb7   : > { %v1087_v22 = vadd.f32 %v1079_v42, %v1023_v30  ;;  %v1088_v27 = vadd.f32 %v1080_v62, %v1024_v24  ;;  %v1089_v29 = vadd.f32 %v1081_v58, %v1025_v19  ;;  %v1090_v59 = vadd.f32 %v1082_v0, %v1026_v28 }
  0xb8   : > { %v1091_v60 = vadd.f32 %v1083_v56, %v1027_v16  ;;  %v1092_v61 = vadd.f32 %v1084_v23, %v1028_v17  ;;  %v1093_v25 = vadd.f32 %v1085_v3, %v1029_v18  ;;  %v1094_v63 = vadd.f32 %v1086_v4, %v1030_v21 }
  0xb9   : > { %v3254_v26 = vrot.slane %v3253_v1, %v2430_v32  ;;  %v3255_v40 = vrot.slane %v3253_v1, %v2432_v33  ;;  %v3256_v46 = vrot.slane %v3253_v1, %v2434_v34  ;;  %v3257_v53 = vrot.slane %v3253_v1, %v2436_v35 }
  0xba   : > { %v3258_v42 = vrot.slane %v3253_v1, %v2438_v36  ;;  %v3259_v58 = vrot.slane %v3253_v1, %v2443_v37  ;;  %v3260_v56 = vrot.slane %v3253_v1, %v2445_v38  ;;  %v3261_v2 = vrot.slane %v3253_v1, %v2447_v39 }
  0xbb   : > { %v1143_v15 = vmul.f32 %v3254_v26, %v1100_v13  ;;  %v1144_v45 = vmul.f32 %v3255_v40, %v1100_v13  ;;  %v1145_v47 = vmul.f32 %v3256_v46, %v1100_v13  ;;  %v1146_v54 = vmul.f32 %v3257_v53, %v1100_v13 }
  0xbc   : > { %v1147_v62 = vmul.f32 %v3258_v42, %v1100_v13  ;;  %v1148_v0 = vmul.f32 %v3259_v58, %v1100_v13  ;;  %v1149_v23 = vmul.f32 %v3260_v56, %v1100_v13  ;;  %v1150_v3 = vmul.f32 %v3261_v2, %v1100_v13 }
  0xbd   : > { %v1151_v43 = vadd.f32 %v1143_v15, %v1087_v22  ;;  %v1152_v4 = vadd.f32 %v1144_v45, %v1088_v27  ;;  %v1153_v5 = vadd.f32 %v1145_v47, %v1089_v29  ;;  %v1198_v7 = vrot.slane %v3262_v6, %v2447_v39  ;;  %v1280_v22 = vpop.permute.xlu1 %1279  ;;  %v1408_v27 = vpop.permute.xlu0 %1407 }
  0xbe   : > { %v1154_v8 = vadd.f32 %v1146_v54, %v1090_v59  ;;  %v1155_v31 = vadd.f32 %v1147_v62, %v1091_v60  ;;  %v1156_v9 = vadd.f32 %v1148_v0, %v1092_v61  ;;  %v1157_v55 = vadd.f32 %v1149_v23, %v1093_v25 }
  0xbf   : > { %v1158_v10 = vadd.f32 %v1150_v3, %v1094_v63  ;;  %v3263_v12 = vrot.slane %v3262_v6, %v2430_v32  ;;  %v3264_v14 = vrot.slane %v3262_v6, %v2432_v33  ;;  %v3265_v13 = vrot.slane %v3262_v6, %v2434_v34 }
  0xc0   : > { %v3266_v50 = vrot.slane %v3262_v6, %v2436_v35  ;;  %v3267_v41 = vrot.slane %v3262_v6, %v2438_v36  ;;  %v3268_v30 = vrot.slane %v3262_v6, %v2443_v37  ;;  %v3269_v19 = vrot.slane %v3262_v6, %v2445_v38 }
  0xc1   : > { %v1207_v44 = vmul.f32 %v3263_v12, %v1164_v20  ;;  %v1208_v48 = vmul.f32 %v3264_v14, %v1164_v20  ;;  %v1209_v49 = vmul.f32 %v3265_v13, %v1164_v20  ;;  %v1214_v16 = vmul.f32 %v1198_v7, %v1164_v20 }
  0xc2   : > { %v1210_v51 = vmul.f32 %v3266_v50, %v1164_v20  ;;  %v1211_v11 = vmul.f32 %v3267_v41, %v1164_v20  ;;  %v1212_v24 = vmul.f32 %v3268_v30, %v1164_v20  ;;  %v1213_v28 = vmul.f32 %v3269_v19, %v1164_v20 }
  0xc3   : > { %v1215_v17 = vadd.f32 %v1207_v44, %v1151_v43  ;;  %v1216_v18 = vadd.f32 %v1208_v48, %v1152_v4  ;;  %v1217_v21 = vadd.f32 %v1209_v49, %v1153_v5  ;;  %v2931_v25 = vrot.slane %v1408_v27, %v2430_v32  ;;  %v1332_v43 = vpop.permute.xlu1 %1331 }
  0xc4   : > { %v1218_v29 = vadd.f32 %v1210_v51, %v1154_v8  ;;  %v1219_v59 = vadd.f32 %v1211_v11, %v1155_v31  ;;  %v1220_v60 = vadd.f32 %v1212_v24, %v1156_v9  ;;  %v1221_v61 = vadd.f32 %v1213_v28, %v1157_v55 }
  0xc5   : > { %v1222_v63 = vadd.f32 %v1214_v16, %v1158_v10  ;;  %v1233_v1 = vrot.slane %v1215_v17, %v2430_v32  ;;  %v1237_v26 = vrot.slane %v1216_v18, %v2430_v32  ;;  %v1241_v15 = vrot.slane %v1217_v21, %v2430_v32 }
  0xc6   : > { %v1245_v40 = vrot.slane %v1218_v29, %v2430_v32  ;;  %v1249_v45 = vrot.slane %v1219_v59, %v2430_v32  ;;  %v1253_v46 = vrot.slane %v1220_v60, %v2430_v32  ;;  %v1257_v47 = vrot.slane %v1221_v61, %v2430_v32 }
  0xc7   : > { %v1261_v53 = vrot.slane %v1222_v63, %v2430_v32  ;;  %v1262_v54 = vmul.f32 %v1233_v1, %v2879_v52  ;;  %v1263_v20 = vmul.f32 %v1237_v26, %v2879_v52  ;;  %v1264_v42 = vmul.f32 %v1241_v15, %v2879_v52  ;;  %v1432_v50 = vpop.permute.xlu1 %1431 }
  0xc8   : > { %v1265_v62 = vmul.f32 %v1245_v40, %v2879_v52  ;;  %v1266_v58 = vmul.f32 %v1249_v45, %v2879_v52  ;;  %v1267_v0 = vmul.f32 %v1253_v46, %v2879_v52  ;;  %v1268_v56 = vmul.f32 %v1257_v47, %v2879_v52 }
  0xc9   : > { %v1269_v23 = vmul.f32 %v1261_v53, %v2879_v52  ;;  %v1285_v2 = vrot.slane %v1215_v17, %v2432_v33  ;;  %v1289_v3 = vrot.slane %v1216_v18, %v2432_v33  ;;  %v1293_v4 = vrot.slane %v1217_v21, %v2432_v33 }
  0xca   : > { %v1297_v5 = vrot.slane %v1218_v29, %v2432_v33  ;;  %v1301_v6 = vrot.slane %v1219_v59, %v2432_v33  ;;  %v1305_v7 = vrot.slane %v1220_v60, %v2432_v33  ;;  %v1309_v8 = vrot.slane %v1221_v61, %v2432_v33 }
  0xcb   : > { %v1313_v31 = vrot.slane %v1222_v63, %v2432_v33  ;;  %v1314_v9 = vmul.f32 %v1285_v2, %v1280_v22  ;;  %v1315_v55 = vmul.f32 %v1289_v3, %v1280_v22  ;;  %v1316_v52 = vmul.f32 %v1293_v4, %v1280_v22 }
  0xcc   : > { %v1317_v10 = vmul.f32 %v1297_v5, %v1280_v22  ;;  %v1318_v12 = vmul.f32 %v1301_v6, %v1280_v22  ;;  %v1319_v44 = vmul.f32 %v1305_v7, %v1280_v22  ;;  %v1320_v14 = vmul.f32 %v1309_v8, %v1280_v22 }
  0xcd   : > { %v1321_v48 = vmul.f32 %v1313_v31, %v1280_v22  ;;  %v1322_v13 = vadd.f32 %v1314_v9, %v1262_v54  ;;  %v1323_v49 = vadd.f32 %v1315_v55, %v1263_v20  ;;  %v1324_v51 = vadd.f32 %v1316_v52, %v1264_v42  ;;  %v1508_v52 = vpop.permute.xlu0 %1507 }
  0xce   : > { %v1325_v41 = vadd.f32 %v1317_v10, %v1265_v62  ;;  %v1326_v11 = vadd.f32 %v1318_v12, %v1266_v58  ;;  %v1327_v30 = vadd.f32 %v1319_v44, %v1267_v0  ;;  %v1328_v24 = vadd.f32 %v1320_v14, %v1268_v56  ;;  %v1481_v62 = vpop.permute.xlu1 %1480 }
  0xcf   : > { %v1329_v19 = vadd.f32 %v1321_v48, %v1269_v23  ;;  %v1337_v28 = vrot.slane %v1215_v17, %v2434_v34  ;;  %v1341_v16 = vrot.slane %v1216_v18, %v2434_v34  ;;  %v1345_v27 = vrot.slane %v1217_v21, %v2434_v34 }
  0xd0   : > { %v1349_v1 = vrot.slane %v1218_v29, %v2434_v34  ;;  %v1353_v26 = vrot.slane %v1219_v59, %v2434_v34  ;;  %v1357_v22 = vrot.slane %v1220_v60, %v2434_v34  ;;  %v1361_v15 = vrot.slane %v1221_v61, %v2434_v34 }
  0xd1   : > { %v1365_v40 = vrot.slane %v1222_v63, %v2434_v34  ;;  %v1366_v45 = vmul.f32 %v1337_v28, %v1332_v43  ;;  %v1367_v46 = vmul.f32 %v1341_v16, %v1332_v43  ;;  %v1368_v47 = vmul.f32 %v1345_v27, %v1332_v43 }
  0xd2   : > { %v1369_v53 = vmul.f32 %v1349_v1, %v1332_v43  ;;  %v1370_v54 = vmul.f32 %v1353_v26, %v1332_v43  ;;  %v1371_v17 = vmul.f32 %v1357_v22, %v1332_v43  ;;  %v1372_v20 = vmul.f32 %v1361_v15, %v1332_v43  ;;  %v1533_v44 = vpop.permute.xlu1 %1532 }
  0xd3   : > { %v1373_v18 = vmul.f32 %v1365_v40, %v1332_v43  ;;  %v1374_v42 = vadd.f32 %v1366_v45, %v1322_v13  ;;  %v1375_v21 = vadd.f32 %v1367_v46, %v1323_v49  ;;  %v1376_v29 = vadd.f32 %v1368_v47, %v1324_v51 }
  0xd4   : > { %v1377_v58 = vadd.f32 %v1369_v53, %v1325_v41  ;;  %v1378_v59 = vadd.f32 %v1370_v54, %v1326_v11  ;;  %v1379_v0 = vadd.f32 %v1371_v17, %v1327_v30  ;;  %v1380_v60 = vadd.f32 %v1372_v20, %v1328_v24 }
  0xd5   : > { %v1381_v56 = vadd.f32 %v1373_v18, %v1329_v19  ;;  %v1387_v61 = vadd.f32 %v2893_v57, %v1374_v42  ;;  %v1388_v63 = vadd.f32 %v2893_v57, %v1375_v21  ;;  %v1389_v23 = vadd.f32 %v2893_v57, %v1376_v29 }
  0xd6   : > { %v1390_v2 = vadd.f32 %v2893_v57, %v1377_v58  ;;  %v1391_v3 = vadd.f32 %v2893_v57, %v1378_v59  ;;  %v1392_v43 = vadd.f32 %v2893_v57, %v1379_v0  ;;  %v1393_v4 = vadd.f32 %v2893_v57, %v1380_v60 }
  0xd7   : > { %v1394_v5 = vadd.f32 %v2893_v57, %v1381_v56  ;;  %v1395_v6 = vmax.f32 %v1387_v61, 0.0  ;;  %v1396_v7 = vmax.f32 %v1388_v63, 0.0  ;;  %v1397_v8 = vmax.f32 %v1389_v23, 0.0 }
  0xd8   : > { %v1398_v31 = vmax.f32 %v1390_v2, 0.0  ;;  %v1399_v9 = vmax.f32 %v1391_v3, 0.0  ;;  %v1400_v55 = vmax.f32 %v1392_v43, 0.0  ;;  %v1401_v10 = vmax.f32 %v1393_v4, 0.0 }
  0xd9   : > { %v1402_v12 = vmax.f32 %v1394_v5, 0.0  ;;  %v1513_v14 = vrot.slane %v1508_v52, %v2430_v32  ;;  %v1414_v48 = vmul.f32 %v2931_v25, %v1395_v6  ;;  %v1415_v13 = vmul.f32 %v2931_v25, %v1396_v7 }
  0xda   : > { %v1416_v49 = vmul.f32 %v2931_v25, %v1397_v8  ;;  %v1417_v57 = vmul.f32 %v2931_v25, %v1398_v31  ;;  %v1418_v51 = vmul.f32 %v2931_v25, %v1399_v9  ;;  %v1419_v41 = vmul.f32 %v2931_v25, %v1400_v55 }
  0xdb   : > { %v1437_v11 = vrot.slane %v1432_v50, %v2430_v32  ;;  %v1420_v30 = vmul.f32 %v2931_v25, %v1401_v10  ;;  %v1421_v24 = vmul.f32 %v2931_v25, %v1402_v12  ;;  %v1486_v19 = vrot.slane %v1481_v62, %v2430_v32 }
  0xdc   : > { %v1538_v28 = vrot.slane %v1533_v44, %v2430_v32 }
  0xdd   : > { %v1438_v16 = vmul.f32 %v1437_v11, %v1395_v6  ;;  %v1439_v27 = vmul.f32 %v1437_v11, %v1396_v7  ;;  %v1440_v1 = vmul.f32 %v1437_v11, %v1397_v8  ;;  %v1441_v26 = vmul.f32 %v1437_v11, %v1398_v31 }
  0xde   : > { %v1442_v22 = vmul.f32 %v1437_v11, %v1399_v9  ;;  %v1443_v15 = vmul.f32 %v1437_v11, %v1400_v55  ;;  %v1444_v40 = vmul.f32 %v1437_v11, %v1401_v10  ;;  %v1445_v45 = vmul.f32 %v1437_v11, %v1402_v12 }
  0xdf   : > { %v1454_v46 = vrot.slane %v1438_v16, 1  ;;  %v1455_v47 = vrot.slane %v1439_v27, 1  ;;  %v1456_v53 = vrot.slane %v1440_v1, 1  ;;  %v1457_v50 = vrot.slane %v1441_v26, 1 }
  0xe0   : > { %v1458_v54 = vrot.slane %v1442_v22, 1  ;;  %v1459_v17 = vrot.slane %v1443_v15, 1  ;;  %v1460_v20 = vrot.slane %v1444_v40, 1  ;;  %v1461_v25 = vrot.slane %v1445_v45, 1 }
  0xe1   : > { %v1470_v18 = vadd.f32 %v1454_v46, %v1414_v48  ;;  %v1471_v42 = vadd.f32 %v1455_v47, %v1415_v13  ;;  %v1472_v21 = vadd.f32 %v1456_v53, %v1416_v49  ;;  %v1473_v62 = vadd.f32 %v1457_v50, %v1417_v57 }
  0xe2   : > { %v1474_v29 = vadd.f32 %v1458_v54, %v1418_v51  ;;  %v1475_v58 = vadd.f32 %v1459_v17, %v1419_v41  ;;  %v1476_v59 = vadd.f32 %v1460_v20, %v1420_v30  ;;  %v1477_v0 = vadd.f32 %v1461_v25, %v1421_v24 }
  0xe3   : > { %v1487_v60 = vadd.f32 %v1486_v19, %v1470_v18  ;;  %v1488_v56 = vadd.f32 %v1486_v19, %v1471_v42  ;;  %v1489_v61 = vadd.f32 %v1486_v19, %v1472_v21  ;;  %v1490_v63 = vadd.f32 %v1486_v19, %v1473_v62  ;;  %v516_v18 = vld [vmem:[%s509_s22] sm:$0xff] }
  0xe4   : > { %v1491_v23 = vadd.f32 %v1486_v19, %v1474_v29  ;;  %v1492_v2 = vadd.f32 %v1486_v19, %v1475_v58  ;;  %v1493_v3 = vadd.f32 %v1486_v19, %v1476_v59  ;;  %v1494_v43 = vadd.f32 %v1486_v19, %v1477_v0 }
  0xe5   : > { %v1495_v4 = vmax.f32 %v1487_v60, 0.0  ;;  %v1496_v5 = vmax.f32 %v1488_v56, 0.0  ;;  %v1497_v6 = vmax.f32 %v1489_v61, 0.0  ;;  %v1498_v7 = vmax.f32 %v1490_v63, 0.0 }
  0xe6   : > { %v1499_v8 = vmax.f32 %v1491_v23, 0.0  ;;  %v1500_v31 = vmax.f32 %v1492_v2, 0.0  ;;  %v1501_v9 = vmax.f32 %v1493_v3, 0.0  ;;  %v1502_v55 = vmax.f32 %v1494_v43, 0.0 }
  0xe7   : > { %v1514_v52 = vmul.f32 %v1513_v14, %v1495_v4  ;;  %v1515_v10 = vmul.f32 %v1513_v14, %v1496_v5  ;;  %v1516_v12 = vmul.f32 %v1513_v14, %v1497_v6  ;;  %v1517_v44 = vmul.f32 %v1513_v14, %v1498_v7 }
  0xe8   : > { %v1518_v48 = vmul.f32 %v1513_v14, %v1499_v8  ;;  %v1519_v13 = vmul.f32 %v1513_v14, %v1500_v31  ;;  %v1520_v49 = vmul.f32 %v1513_v14, %v1501_v9  ;;  %v1521_v57 = vmul.f32 %v1513_v14, %v1502_v55  ;;  %v1633_v55 = vpop.permute.xlu0 %1632 }
  0xe9   : > { %v1539_v51 = vadd.f32 %v1538_v28, %v1514_v52  ;;  %v1540_v41 = vadd.f32 %v1538_v28, %v1515_v10  ;;  %v1541_v11 = vadd.f32 %v1538_v28, %v1516_v12  ;;  %v1542_v30 = vadd.f32 %v1538_v28, %v1517_v44 }
  0xea   : > { %v1543_v24 = vadd.f32 %v1538_v28, %v1518_v48  ;;  %v2985_v19 = vadd.f32 %v1538_v28, %v1519_v13  ;;  %v2987_v16 = vadd.f32 %v1538_v28, %v1520_v49  ;;  %v2989_v27 = vadd.f32 %v1538_v28, %v1521_v57 }
  0xeb   : > { %v1547_v1 = vmul.f32 0.5, %v1539_v51  ;;  %v1548_v26 = vmul.f32 0.5, %v1540_v41  ;;  %v1549_v22 = vmul.f32 0.5, %v1541_v11  ;;  %v1550_v15 = vmul.f32 0.5, %v1542_v30 }
  0xec   : > { %v1551_v40 = vmul.f32 0.5, %v1543_v24  ;;  %v1552_v45 = vmul.f32 0.5, %v2985_v19  ;;  %v1553_v14 = vmul.f32 0.5, %v2987_v16  ;;  %v1554_v50 = vmul.f32 0.5, %v2989_v27 }
  0xed   : > { %v1555_v46 = vmul.f32 1.442695, %v1547_v1  ;;  %v1557_v47 = vmul.f32 1.442695, %v1548_v26  ;;  %v1559_v53 = vmul.f32 1.442695, %v1549_v22  ;;  %v1575_v42 = vrot.slane %v516_v18, %v2430_v32 }
  0xee   : > { %v1561_v54 = vmul.f32 1.442695, %v1550_v15  ;;  %v1563_v17 = vmul.f32 1.442695, %v1551_v40  ;;  %v1565_v28 = vmul.f32 1.442695, %v1552_v45  ;;  %v1579_v21 = vrot.slane %v516_v18, %v2432_v33 }
  0xef   : > { %2231 = vpow2.f32 %v1555_v46  ;;  %v1567_v20 = vmul.f32 1.442695, %v1553_v14  ;;  %v1569_v25 = vmul.f32 1.442695, %v1554_v50  ;;  %v1583_v62 = vrot.slane %v516_v18, %v2434_v34 }
  0xf0   : > { %2233 = vpow2.f32 %v1557_v47  ;;  %v1587_v58 = vrot.slane %v516_v18, %v2436_v35  ;;  %v1591_v0 = vrot.slane %v516_v18, %v2438_v36  ;;  %v1595_v61 = vrot.slane %v516_v18, %v2443_v37 }
  0xf1   : > { %2235 = vpow2.f32 %v1559_v53  ;;  %v1599_v2 = vrot.slane %v516_v18, %v2445_v38  ;;  %v1603_v5 = vrot.slane %v516_v18, %v2447_v39  ;;  %v1686_v39 = vpop.permute.xlu1 %1685 }
  0xf2   : > { %2237 = vpow2.f32 %v1561_v54 }
  0xf3   : > { %2239 = vpow2.f32 %v1563_v17 }
  0xf4   : > { %2241 = vpow2.f32 %v1565_v28 }
  0xf5   : > { %2243 = vpow2.f32 %v1567_v20 }
  0xf6   : > { %2245 = vpow2.f32 %v1569_v25 }
  0xfc   : > { %v2232_v29 = vpop.eup %2231 }
  0xfd   : > { %v2234_v59 = vpop.eup %2233  ;;  %v1612_v60 = vmul.f32 %v2232_v29, %v1575_v42 }
  0xfe   : > { %v2236_v56 = vpop.eup %2235  ;;  %v1613_v63 = vmul.f32 %v2234_v59, %v1579_v21 }
  0xff   : > { %v2238_v23 = vpop.eup %2237  ;;  %v1614_v3 = vmul.f32 %v2236_v56, %v1583_v62  ;;  %v1620_v43 = vadd.f32 %v1612_v60, %v1539_v51 }
 0x100   : > { %v2240_v4 = vpop.eup %2239  ;;  %v1615_v6 = vmul.f32 %v2238_v23, %v1587_v58  ;;  %v1621_v7 = vadd.f32 %v1613_v63, %v1540_v41 }
 0x101   : > { %v2242_v8 = vpop.eup %2241  ;;  %v1616_v35 = vmul.f32 %v2240_v4, %v1591_v0  ;;  %v1622_v31 = vadd.f32 %v1614_v3, %v1541_v11  ;;  %v1638_v36 = vrot.slane %v1620_v43, %v2430_v32 }
 0x102   : > { %v2244_v9 = vpop.eup %2243  ;;  %v1617_v52 = vmul.f32 %v2242_v8, %v1595_v61  ;;  %v1623_v37 = vadd.f32 %v1615_v6, %v1542_v30  ;;  %v1642_v10 = vrot.slane %v1621_v7, %v2430_v32  ;;  %v1761_v8 = vpop.permute.xlu1 %1760 }
 0x103   : > { %v2246_v12 = vpop.eup %2245  ;;  %v1618_v38 = vmul.f32 %v2244_v9, %v1599_v2  ;;  %v1624_v44 = vadd.f32 %v1616_v35, %v1543_v24  ;;  %v1646_v48 = vrot.slane %v1622_v31, %v2430_v32  ;;  %v1667_v13 = vmul.f32 %v1638_v36, %v1633_v55 }
 0x104   : > { %v1619_v49 = vmul.f32 %v2246_v12, %v1603_v5  ;;  %v1625_v57 = vadd.f32 %v1617_v52, %v2985_v19  ;;  %v1650_v51 = vrot.slane %v1623_v37, %v2430_v32  ;;  %v1668_v41 = vmul.f32 %v1642_v10, %v1633_v55 }
 0x105   : > { %v1626_v11 = vadd.f32 %v1618_v38, %v2987_v16  ;;  %v1654_v1 = vrot.slane %v1624_v44, %v2430_v32  ;;  %v1669_v30 = vmul.f32 %v1646_v48, %v1633_v55  ;;  %v1688_v26 = vadd.f32 %v1686_v39, %v1667_v13 }
 0x106   : > { %v1627_v22 = vadd.f32 %v1619_v49, %v2989_v27  ;;  %v1658_v24 = vrot.slane %v1625_v57, %v2430_v32  ;;  %v1670_v15 = vmul.f32 %v1650_v51, %v1633_v55  ;;  %v1689_v40 = vadd.f32 %v1686_v39, %v1668_v41  ;;  %v1709_v27 = vpop.permute.xlu0 %1708 }
 0x107   : > { %v1662_v45 = vrot.slane %v1626_v11, %v2430_v32  ;;  %v1671_v14 = vmul.f32 %v1654_v1, %v1633_v55  ;;  %v1690_v46 = vadd.f32 %v1686_v39, %v1669_v30  ;;  %v1696_v19 = vmax.f32 %v1688_v26, 0.0 }
 0x108   : > { %v1666_v47 = vrot.slane %v1627_v22, %v2430_v32  ;;  %v1672_v53 = vmul.f32 %v1658_v24, %v1633_v55  ;;  %v1691_v50 = vadd.f32 %v1686_v39, %v1670_v15  ;;  %v1697_v16 = vmax.f32 %v1689_v40, 0.0 }
 0x109   : > { %v1673_v54 = vmul.f32 %v1662_v45, %v1633_v55  ;;  %v1692_v17 = vadd.f32 %v1686_v39, %v1671_v14  ;;  %v1698_v28 = vmax.f32 %v1690_v46, 0.0  ;;  %v1714_v20 = vrot.slane %v1696_v19, %v2430_v32  ;;  %v1839_v46 = vpop.permute.xlu1 %1838 }
 0x10a   : > { %v1674_v25 = vmul.f32 %v1666_v47, %v1633_v55  ;;  %v1693_v18 = vadd.f32 %v1686_v39, %v1672_v53  ;;  %v1699_v42 = vmax.f32 %v1691_v50, 0.0  ;;  %v1718_v21 = vrot.slane %v1697_v16, %v2430_v32  ;;  %v1814_v24 = vpop.permute.xlu0 %1813 }
 0x10b   : > { %v1694_v62 = vadd.f32 %v1686_v39, %v1673_v54  ;;  %v1700_v29 = vmax.f32 %v1692_v17, 0.0  ;;  %v1722_v58 = vrot.slane %v1698_v28, %v2430_v32  ;;  %v1743_v59 = vmul.f32 %v1714_v20, %v1709_v27 }
 0x10c   : > { %v1695_v0 = vadd.f32 %v1686_v39, %v1674_v25  ;;  %v1701_v60 = vmax.f32 %v1693_v18, 0.0  ;;  %v1726_v56 = vrot.slane %v1699_v42, %v2430_v32  ;;  %v1744_v61 = vmul.f32 %v1718_v21, %v1709_v27 }
 0x10d   : > { %v1702_v63 = vmax.f32 %v1694_v62, 0.0  ;;  %v1730_v23 = vrot.slane %v1700_v29, %v2430_v32  ;;  %v1745_v2 = vmul.f32 %v1722_v58, %v1709_v27  ;;  %v1766_v3 = vrot.slane %v1696_v19, %v2432_v33 }
 0x10e   : > { %v1703_v43 = vmax.f32 %v1695_v0, 0.0  ;;  %v1734_v4 = vrot.slane %v1701_v60, %v2430_v32  ;;  %v1746_v5 = vmul.f32 %v1726_v56, %v1709_v27  ;;  %v1770_v6 = vrot.slane %v1697_v16, %v2432_v33  ;;  %v1844_v56 = vpop.permute.xlu0 %1843 }
 0x10f   : > { %v1738_v7 = vrot.slane %v1702_v63, %v2430_v32  ;;  %v1747_v35 = vmul.f32 %v1730_v23, %v1709_v27  ;;  %v1774_v31 = vrot.slane %v1698_v28, %v2432_v33  ;;  %v1778_v36 = vrot.slane %v1699_v42, %v2432_v33 }
 0x110   : > { %v1742_v9 = vrot.slane %v1703_v43, %v2430_v32  ;;  %v1748_v55 = vmul.f32 %v1734_v4, %v1709_v27  ;;  %v1782_v52 = vrot.slane %v1700_v29, %v2432_v33  ;;  %v1786_v37 = vrot.slane %v1701_v60, %v2432_v33 }
 0x111   : > { %v1749_v10 = vmul.f32 %v1738_v7, %v1709_v27  ;;  %v1790_v12 = vrot.slane %v1702_v63, %v2432_v33  ;;  %v1794_v38 = vrot.slane %v1703_v43, %v2432_v33  ;;  %v1795_v44 = vmul.f32 %v1766_v3, %v1761_v8  ;;  %v1912_v3 = vpop.permute.xlu1 %1911 }
 0x112   : > { %v1750_v48 = vmul.f32 %v1742_v9, %v1709_v27  ;;  %v1796_v13 = vmul.f32 %v1770_v6, %v1761_v8  ;;  %v1797_v39 = vmul.f32 %v1774_v31, %v1761_v8  ;;  %v1798_v49 = vmul.f32 %v1778_v36, %v1761_v8 }
 0x113   : > { %v1799_v57 = vmul.f32 %v1782_v52, %v1761_v8  ;;  %v1800_v51 = vmul.f32 %v1786_v37, %v1761_v8  ;;  %v1801_v41 = vmul.f32 %v1790_v12, %v1761_v8  ;;  %v1802_v11 = vmul.f32 %v1794_v38, %v1761_v8  ;;  %v1916_v38 = vpop.permute.xlu0 %1915 }
 0x114   : > { %v1803_v1 = vadd.f32 %v1795_v44, %v1743_v59  ;;  %v1804_v30 = vadd.f32 %v1796_v13, %v1744_v61  ;;  %v1805_v26 = vadd.f32 %v1797_v39, %v1745_v2  ;;  %v1806_v22 = vadd.f32 %v1798_v49, %v1746_v5 }
 0x115   : > { %v1807_v15 = vadd.f32 %v1799_v57, %v1747_v35  ;;  %v1808_v40 = vadd.f32 %v1800_v51, %v1748_v55  ;;  %v1809_v45 = vadd.f32 %v1801_v41, %v1749_v10  ;;  %v1810_v14 = vadd.f32 %v1802_v11, %v1750_v48  ;;  %v3114_v11 = vpop.permute.xlu1 %1983 }
 0x116   : > { %v1816_v19 = vadd.f32 %v1814_v24, %v1803_v1  ;;  %v1817_v47 = vadd.f32 %v1814_v24, %v1804_v30  ;;  %v1818_v53 = vadd.f32 %v1814_v24, %v1805_v26  ;;  %v1819_v50 = vadd.f32 %v1814_v24, %v1806_v22 }
 0x117   : > { %v1820_v16 = vadd.f32 %v1814_v24, %v1807_v15  ;;  %v1821_v54 = vadd.f32 %v1814_v24, %v1808_v40  ;;  %v1822_v17 = vadd.f32 %v1814_v24, %v1809_v45  ;;  %v1823_v28 = vadd.f32 %v1814_v24, %v1810_v14 }
 0x118   : > { %v3034_v20 = vmax.f32 %v1816_v19, 0.0  ;;  %v3036_v27 = vmax.f32 %v1817_v47, 0.0  ;;  %v3038_v25 = vmax.f32 %v1818_v53, 0.0  ;;  %v3040_v18 = vmax.f32 %v1819_v50, 0.0 }
 0x119   : > { %v3042_v42 = vmax.f32 %v1820_v16, 0.0  ;;  %v3044_v21 = vmax.f32 %v1821_v54, 0.0  ;;  %v3046_v62 = vmax.f32 %v1822_v17, 0.0  ;;  %v3048_v29 = vmax.f32 %v1823_v28, 0.0 }
 0x11a   : > { %v1849_v58 = vrot.slane %v3034_v20, %v2430_v32  ;;  %v1853_v59 = vrot.slane %v3036_v27, %v2430_v32  ;;  %v1857_v0 = vrot.slane %v3038_v25, %v2430_v32  ;;  %v1861_v60 = vrot.slane %v3040_v18, %v2430_v32 }
 0x11b   : > { %v1865_v61 = vrot.slane %v3042_v42, %v2430_v32  ;;  %v1869_v63 = vrot.slane %v3044_v21, %v2430_v32  ;;  %v1873_v23 = vrot.slane %v3046_v62, %v2430_v32  ;;  %v1877_v2 = vrot.slane %v3048_v29, %v2430_v32 }
 0x11c   : > { %v3066_v43 = vmul.f32 %v1849_v58, %v1839_v46  ;;  %v3068_v4 = vmul.f32 %v1853_v59, %v1839_v46  ;;  %v3070_v5 = vmul.f32 %v1857_v0, %v1839_v46  ;;  %v3072_v6 = vmul.f32 %v1861_v60, %v1839_v46 }
 0x11d   : > { %v3074_v7 = vmul.f32 %v1865_v61, %v1839_v46  ;;  %v3076_v8 = vmul.f32 %v1869_v63, %v1839_v46  ;;  %v3078_v35 = vmul.f32 %v1873_v23, %v1839_v46  ;;  %v3080_v31 = vmul.f32 %v1877_v2, %v1839_v46 }
 0x11e   : > { %v1921_v32 = vrot.slane %v3034_v20, %v2432_v33  ;;  %v1925_v36 = vrot.slane %v3036_v27, %v2432_v33  ;;  %v1929_v9 = vrot.slane %v3038_v25, %v2432_v33  ;;  %v1933_v55 = vrot.slane %v3040_v18, %v2432_v33 }
 0x11f   : > { %v1937_v52 = vrot.slane %v3042_v42, %v2432_v33  ;;  %v1941_v37 = vrot.slane %v3044_v21, %v2432_v33  ;;  %v1945_v10 = vrot.slane %v3046_v62, %v2432_v33  ;;  %v1949_v12 = vrot.slane %v3048_v29, %v2432_v33 }
 0x120   : > { %v3098_v44 = vmul.f32 %v1921_v32, %v1912_v3  ;;  %v3100_v48 = vmul.f32 %v1925_v36, %v1912_v3  ;;  %v3102_v13 = vmul.f32 %v1929_v9, %v1912_v3  ;;  %v3104_v39 = vmul.f32 %v1933_v55, %v1912_v3 }
 0x121   : > { %v3106_v49 = vmul.f32 %v1937_v52, %v1912_v3  ;;  %v3108_v57 = vmul.f32 %v1941_v37, %v1912_v3  ;;  %v3110_v51 = vmul.f32 %v1945_v10, %v1912_v3  ;;  %v3112_v41 = vmul.f32 %v1949_v12, %v1912_v3 }
 0x122   : > { %v1958_v33 = vmul.f32 %v1921_v32, %v1916_v38  ;;  %v1959_v1 = vmul.f32 %v1925_v36, %v1916_v38  ;;  %v1960_v30 = vmul.f32 %v1929_v9, %v1916_v38  ;;  %v1961_v26 = vmul.f32 %v1933_v55, %v1916_v38  ;;  %v1988_v32 = vpop.permute.xlu1 %1987 }
 0x123   : > { %v1962_v22 = vmul.f32 %v1937_v52, %v1916_v38  ;;  %v1963_v24 = vmul.f32 %v1941_v37, %v1916_v38  ;;  %v1964_v15 = vmul.f32 %v1945_v10, %v1916_v38  ;;  %v1965_v40 = vmul.f32 %v1949_v12, %v1916_v38 }
 0x124   : > { %v1886_v45 = vmul.f32 %v1849_v58, %v1844_v56  ;;  %v1887_v14 = vmul.f32 %v1853_v59, %v1844_v56  ;;  %v1888_v46 = vmul.f32 %v1857_v0, %v1844_v56  ;;  %v1889_v19 = vmul.f32 %v1861_v60, %v1844_v56 }
 0x125   : > { %v1890_v47 = vmul.f32 %v1865_v61, %v1844_v56  ;;  %v1891_v53 = vmul.f32 %v1869_v63, %v1844_v56  ;;  %v1892_v50 = vmul.f32 %v1873_v23, %v1844_v56  ;;  %v1893_v16 = vmul.f32 %v1877_v2, %v1844_v56 }
 0x126   : > { %v1974_v54 = vadd.f32 %v1958_v33, %v1886_v45  ;;  %v1975_v17 = vadd.f32 %v1959_v1, %v1887_v14  ;;  %v1976_v28 = vadd.f32 %v1960_v30, %v1888_v46  ;;  %v1977_v3 = vadd.f32 %v1961_v26, %v1889_v19  ;;  %v2062_v37 = vpop.permute.xlu1 %2061 }
 0x127   : > { %v1978_v36 = vadd.f32 %v1962_v22, %v1890_v47  ;;  %v1979_v9 = vadd.f32 %v1963_v24, %v1891_v53  ;;  %v1980_v55 = vadd.f32 %v1964_v15, %v1892_v50  ;;  %v1981_v52 = vadd.f32 %v1965_v40, %v1893_v16 }
 0x128   : > { %v1993_v58 = vrot.slane %v3034_v20, %v2434_v34  ;;  %v1997_v59 = vrot.slane %v3036_v27, %v2434_v34  ;;  %v2001_v0 = vrot.slane %v3038_v25, %v2434_v34  ;;  %v2005_v60 = vrot.slane %v3040_v18, %v2434_v34 }
 0x129   : > { %v2009_v56 = vrot.slane %v3042_v42, %v2434_v34  ;;  %v2013_v61 = vrot.slane %v3044_v21, %v2434_v34  ;;  %v2017_v63 = vrot.slane %v3046_v62, %v2434_v34  ;;  %v2021_v20 = vrot.slane %v3048_v29, %v2434_v34 }
 0x12a   : > { %v2030_v27 = vmul.f32 %v1993_v58, %v1988_v32  ;;  %v2031_v23 = vmul.f32 %v1997_v59, %v1988_v32  ;;  %v2032_v2 = vmul.f32 %v2001_v0, %v1988_v32  ;;  %v2033_v25 = vmul.f32 %v2005_v60, %v1988_v32 }
 0x12b   : > { %v2034_v10 = vmul.f32 %v2009_v56, %v1988_v32  ;;  %v2035_v18 = vmul.f32 %v2013_v61, %v1988_v32  ;;  %v2036_v12 = vmul.f32 %v2017_v63, %v1988_v32  ;;  %v2037_v38 = vmul.f32 %v2021_v20, %v1988_v32 }
 0x12c   : > { %v2046_v42 = vadd.f32 %v2030_v27, %v1974_v54  ;;  %v2047_v33 = vadd.f32 %v2031_v23, %v1975_v17  ;;  %v2048_v1 = vadd.f32 %v2032_v2, %v1976_v28  ;;  %v2049_v21 = vadd.f32 %v2033_v25, %v1977_v3 }
 0x12d   : > { %v2050_v34 = vadd.f32 %v2034_v10, %v1978_v36  ;;  %v2051_v62 = vadd.f32 %v2035_v18, %v1979_v9  ;;  %v2052_v29 = vadd.f32 %v2036_v12, %v1980_v55  ;;  %v2053_v30 = vadd.f32 %v2037_v38, %v1981_v52 }
 0x12e   : > { %v2072_v26 = vadd.f32 %v2062_v37, %v2046_v42  ;;  %v2073_v22 = vadd.f32 %v2062_v37, %v2047_v33  ;;  %v2074_v24 = vadd.f32 %v2062_v37, %v2048_v1  ;;  %v2075_v15 = vadd.f32 %v2062_v37, %v2049_v21 }
 0x12f   : > { %v2076_v40 = vadd.f32 %v2062_v37, %v2050_v34  ;;  %v2077_v45 = vadd.f32 %v2062_v37, %v2051_v62  ;;  %v2078_v14 = vadd.f32 %v2062_v37, %v2052_v29  ;;  %v2079_v46 = vadd.f32 %v2062_v37, %v2053_v30 }
 0x130   : > { %2089 = vst [vmem:[%s3136_s25 + $0x40] sm:$0x7] %v2072_v26  ;;  %2090 = vst [vmem:[%s3136_s25 + $0x48] sm:$0x7] %v2073_v22  ;;  %v1966_v19 = vadd.f32 %v3098_v44, %v3066_v43  ;;  %v1967_v47 = vadd.f32 %v3100_v48, %v3068_v4  ;;  %v1968_v53 = vadd.f32 %v3102_v13, %v3070_v5 }
 0x131   : > { %2091 = vst [vmem:[%s3136_s25 + $0x50] sm:$0x7] %v2074_v24  ;;  %2092 = vst [vmem:[%s3136_s25 + $0x58] sm:$0x7] %v2075_v15  ;;  %v1969_v50 = vadd.f32 %v3104_v39, %v3072_v6  ;;  %v1970_v16 = vadd.f32 %v3106_v49, %v3074_v7  ;;  %v1971_v43 = vadd.f32 %v3108_v57, %v3076_v8  ;;  %v2057_v39 = vpop.permute.xlu0 %2056 }
 0x132   : > { %2093 = vst [vmem:[%s3136_s25 + $0x60] sm:$0x7] %v2076_v40  ;;  %2094 = vst [vmem:[%s3136_s25 + $0x68] sm:$0x7] %v2077_v45  ;;  %v1972_v4 = vadd.f32 %v3110_v51, %v3078_v35  ;;  %v1973_v5 = vadd.f32 %v3112_v41, %v3080_v31  ;;  %v2022_v44 = vmul.f32 %v1993_v58, %v3114_v11 }
 0x133   : > { %2095 = vst [vmem:[%s3136_s25 + $0x70] sm:$0x7] %v2078_v14  ;;  %2097 = vst.msk [vmem:[%s3136_s25 + $0x78] sm:$0x7] %vm2096_vm11, %v2079_v46  ;;  %v2023_v6 = vmul.f32 %v1997_v59, %v3114_v11  ;;  %v2024_v48 = vmul.f32 %v2001_v0, %v3114_v11  ;;  %v2025_v13 = vmul.f32 %v2005_v60, %v3114_v11 }
 0x134   : > { %v2026_v7 = vmul.f32 %v2009_v56, %v3114_v11  ;;  %v2027_v49 = vmul.f32 %v2013_v61, %v3114_v11  ;;  %v2028_v8 = vmul.f32 %v2017_v63, %v3114_v11  ;;  %v2029_v35 = vmul.f32 %v2021_v20, %v3114_v11 }
 0x135   : > { %v2038_v57 = vadd.f32 %v2022_v44, %v1966_v19  ;;  %v2039_v31 = vadd.f32 %v2023_v6, %v1967_v47  ;;  %v2040_v51 = vadd.f32 %v2024_v48, %v1968_v53  ;;  %v2041_v41 = vadd.f32 %v2025_v13, %v1969_v50 }
 0x136   : > { %v2042_v54 = vadd.f32 %v2026_v7, %v1970_v16  ;;  %v2043_v17 = vadd.f32 %v2027_v49, %v1971_v43  ;;  %v2044_v28 = vadd.f32 %v2028_v8, %v1972_v4  ;;  %v2045_v3 = vadd.f32 %v2029_v35, %v1973_v5 }
 0x137   : > { %v2064_v32 = vadd.f32 %v2057_v39, %v2038_v57  ;;  %v2065_v36 = vadd.f32 %v2057_v39, %v2039_v31  ;;  %v2066_v9 = vadd.f32 %v2057_v39, %v2040_v51  ;;  %v2067_v11 = vadd.f32 %v2057_v39, %v2041_v41 }
 0x138   : > { %v2068_v55 = vadd.f32 %v2057_v39, %v2042_v54  ;;  %v2069_v52 = vadd.f32 %v2057_v39, %v2043_v17  ;;  %v2070_v58 = vadd.f32 %v2057_v39, %v2044_v28  ;;  %v2071_v59 = vadd.f32 %v2057_v39, %v2045_v3 }
 0x139   : > { %2080 = vst [vmem:[%s3136_s25] sm:$0xff] %v2064_v32  ;;  %2081 = vst [vmem:[%s3136_s25 + $0x8] sm:$0xff] %v2065_v36 }
 0x13a   : > { %2082 = vst [vmem:[%s3136_s25 + $0x10] sm:$0xff] %v2066_v9  ;;  %2083 = vst [vmem:[%s3136_s25 + $0x18] sm:$0xff] %v2067_v11 }
 0x13b   : > { %2084 = vst [vmem:[%s3136_s25 + $0x20] sm:$0xff] %v2068_v55  ;;  %2085 = vst [vmem:[%s3136_s25 + $0x28] sm:$0xff] %v2069_v52 }
 0x13c   : > { %2086 = vst [vmem:[%s3136_s25 + $0x30] sm:$0xff] %v2070_v58  ;;  %2088 = vst.msk [vmem:[%s3136_s25 + $0x38] sm:$0xff] %vm2087_vm12, %v2071_v59 }
 0x13d PF: > { %s31_s24 = sadd.s32 1, %s2253_s24  }
 0x13e   : > { %p28_p4 = scmp.ge.s32.totalorder %s31_s24, 4  }
 0x140   :  { %30 = sbr.rel (!%p28_p4) target bundleno = 4 (0x4), region = 113 }

</bundles_post_ra>
